<compile_context>
chip_gen: v6e
topology: v6e:2x2x1
jax: 0.10.0
libtpu: 0.0.40
codegen_flags: <defaults>
</compile_context>

<pallas_src>
import functools

import jax
import jax.numpy as jnp
from jax.experimental import pallas as pl
from jax.experimental.pallas import tpu as pltpu


# ----------------------------------------------------------------------------
# Kernel 1: per-channel sum / sum-of-squares for BatchNorm batch statistics.
# Tiled over the batch grid; the (2, Cin) output block stays resident in VMEM
# across the reduction axis and is initialised at step 0 (standard accumulator).
# ----------------------------------------------------------------------------
def bn_stats_kernel(x_ref, sums_ref):
    @pl.when(pl.program_id(0) == 0)
    def _init():
        sums_ref[...] = jnp.zeros_like(sums_ref)

    x = x_ref[0].astype(jnp.float32)                     # (H*W, Cin)
    s1 = jnp.sum(x, axis=0, keepdims=True)               # (1, Cin)
    s2 = jnp.sum(x * x, axis=0, keepdims=True)           # (1, Cin)
    sums_ref[...] += jnp.concatenate([s1, s2], axis=0)   # (2, Cin)


# ----------------------------------------------------------------------------
# Kernel 2: fused BN(affine) + ReLU + 4-phase transposed conv as a single matmul.
#   x block    : (1, H*W, Cin)  pixel-major (j fastest), channels last
#   output blk : (1, H*W, 4*Cout)  columns ordered [ee | eo | oe | oo]
# ----------------------------------------------------------------------------
def transconv_kernel(x_ref, scale_ref, shift_ref, w_ref, b_ref, o_ref, *, img_w):
    x = x_ref[0].astype(jnp.float32)                     # (H*W, Cin)
    # BN (precomputed scale/shift) + ReLU fused on the load path (free VPU work).
    y = jnp.maximum(x * scale_ref[...] + shift_ref[...], 0.0)
    hw, cin = y.shape

    # Shifted neighbours in pixel-major order: p+1 -> right, p+W -> down.
    zero1 = jnp.zeros((1, cin), jnp.float32)
    zero_w = jnp.zeros((img_w, cin), jnp.float32)
    zero_w1 = jnp.zeros((img_w + 1, cin), jnp.float32)
    y_r = jnp.concatenate([y[1:, :], zero1], axis=0)             # y[i, j+1]
    y_d = jnp.concatenate([y[img_w:, :], zero_w], axis=0)        # y[i+1, j]
    y_dr = jnp.concatenate([y[img_w + 1:, :], zero_w1], axis=0)  # y[i+1, j+1]

    # Right-shifted variants wrap at the last image column -> zero them there.
    col = jax.lax.broadcasted_iota(jnp.int32, (hw, cin), 0) % img_w
    has_right = col < (img_w - 1)
    y_r = jnp.where(has_right, y_r, 0.0)
    y_dr = jnp.where(has_right, y_dr, 0.0)

    # One MXU matmul: (H*W, 4*Cin) @ (4*Cin, 4*Cout), f32 accumulate.
    lhs = jnp.concatenate([y, y_r, y_d, y_dr], axis=1).astype(w_ref.dtype)
    acc = jnp.dot(lhs, w_ref[...], preferred_element_type=jnp.float32)
    o_ref[0] = (acc + b_ref[...]).astype(o_ref.dtype)


# ----------------------------------------------------------------------------
# Wrapper: BN stats pass + fused conv pass + phase interleave (folded into the
# single transpose back to NCHW).
# ----------------------------------------------------------------------------
def trans_conv_forward(x, gamma, beta, w_t, b_t, matmul_dtype=jnp.bfloat16):
    """x: (N, Cin, H, W) NCHW.  w_t: (Cin, Cout, 3, 3) PyTorch ConvTranspose2d weight.
    Returns (N, Cout, 2H, 2W) float32."""
    N, Cin, H, W = x.shape
    Cout = w_t.shape[1]
    HW = H * W
    vmem_limit = 48 * 1024 * 1024   # safe on v5e/v6e (128 MiB) and v7x (64 MiB)

    # Single input layout change: NCHW -> pixel-major channels-last.
    x_pix = jnp.transpose(x, (0, 2, 3, 1)).reshape(N, HW, Cin)

    # ---- pass 1: per-channel sum / sumsq (Pallas, tiled over batch) ----
    sums = pl.pallas_call(
        bn_stats_kernel,
        out_shape=jax.ShapeDtypeStruct((2, Cin), jnp.float32),
        grid_spec=pltpu.PrefetchScalarGridSpec(
            num_scalar_prefetch=0,
            grid=(N,),
            in_specs=[pl.BlockSpec((1, HW, Cin), lambda n: (n, 0, 0))],
            out_specs=pl.BlockSpec((2, Cin), lambda n: (0, 0)),
        ),
        compiler_params=pltpu.CompilerParams(
            dimension_semantics=("arbitrary",),      # reduction axis (resident output)
            vmem_limit_bytes=vmem_limit),
    )(x_pix)

    M = N * HW
    mean = sums[0] / M
    var = jnp.maximum(sums[1] / M - mean * mean, 0.0)   # biased var (train-mode BN)
    inv = jax.lax.rsqrt(var + 1e-5)
    scale = (gamma * inv).reshape(1, Cin).astype(jnp.float32)
    shift = (beta - mean * gamma * inv).reshape(1, Cin).astype(jnp.float32)

    # ---- packed 4-phase weight: rows [Y | right | down | down-right] blocks (Cin each),
    #      cols [ee | eo | oe | oo] blocks (Cout each).  Derived from the flipped /
    #      channel-transposed kernel of the dilate+pad+conv formulation. ----
    def wk(kh, kw):
        return w_t[:, :, kh, kw]                        # (Cin, Cout)
    Z = jnp.zeros((Cin, Cout), w_t.dtype)
    W4 = jnp.concatenate([
        jnp.concatenate([wk(1, 1), wk(1, 2), wk(2, 1), wk(2, 2)], axis=1),  # Y
        jnp.concatenate([Z,        wk(1, 0), Z,        wk(2, 0)], axis=1),  # right nbr
        jnp.concatenate([Z,        Z,        wk(0, 1), wk(0, 2)], axis=1),  # down nbr
        jnp.concatenate([Z,        Z,        Z,        wk(0, 0)], axis=1),  # down-right
    ], axis=0).astype(matmul_dtype)                     # (4*Cin, 4*Cout)
    bias4 = jnp.tile(b_t, 4).reshape(1, 4 * Cout).astype(jnp.float32)

    # ---- pass 2: fused BN+ReLU+4-phase conv ----
    kernel = functools.partial(transconv_kernel, img_w=W)
    out4 = pl.pallas_call(
        kernel,
        out_shape=jax.ShapeDtypeStruct((N, HW, 4 * Cout), jnp.float32),
        grid_spec=pltpu.PrefetchScalarGridSpec(
            num_scalar_prefetch=0,
            grid=(N,),
            in_specs=[
                pl.BlockSpec((1, HW, Cin), lambda n: (n, 0, 0)),
                pl.BlockSpec((1, Cin), lambda n: (0, 0)),
                pl.BlockSpec((1, Cin), lambda n: (0, 0)),
                pl.BlockSpec((4 * Cin, 4 * Cout), lambda n: (0, 0)),
                pl.BlockSpec((1, 4 * Cout), lambda n: (0, 0)),
            ],
            out_specs=pl.BlockSpec((1, HW, 4 * Cout), lambda n: (n, 0, 0)),
        ),
        compiler_params=pltpu.CompilerParams(
            dimension_semantics=("parallel",),          # shards across v7x's 2 TCs
            vmem_limit_bytes=vmem_limit),
    )(x_pix, scale, shift, W4, bias4)

    # Interleave the 4 parity phases, folded into the single NCHW transpose:
    # out4[n, i*W+j, (rp, cp, c)] -> out[n, c, 2i+rp, 2j+cp]
    out = out4.reshape(N, H, W, 2, 2, Cout)
    out = out.transpose(0, 5, 1, 3, 2, 4).reshape(N, Cout, 2 * H, 2 * W)
    return out


# ----------------------------------------------------------------------------
# Pure-JAX reference (independent path via lax.conv_general_dilated)
# ----------------------------------------------------------------------------
def reference(x, gamma, beta, w_t, b_t):
    mean = x.mean(axis=(0, 2, 3), keepdims=True)
    var = x.var(axis=(0, 2, 3), keepdims=True)
    y = (x - mean) / jnp.sqrt(var + 1e-5)
    y = y * gamma.reshape(1, -1, 1, 1) + beta.reshape(1, -1, 1, 1)
    y = jnp.maximum(y, 0.0)
    w_oihw = w_t[:, :, ::-1, ::-1].transpose(1, 0, 2, 3)            # (Cout, Cin, 3, 3)
    out = jax.lax.conv_general_dilated(
        y, w_oihw, window_strides=(1, 1),
        padding=((1, 2), (1, 2)), lhs_dilation=(2, 2),
        dimension_numbers=('NCHW', 'OIHW', 'NCHW'))
    return out + b_t.reshape(1, -1, 1, 1)


if __name__ == "__main__":
    key = jax.random.PRNGKey(0)
    k_x, k_w, k_b = jax.random.split(key, 3)

    N, Cin, H, W = 2, 4, 16, 16
    Cout = Cin // 2

    x = jax.random.normal(k_x, (N, Cin, H, W), dtype=jnp.float32)
    gamma = jnp.ones((Cin,), dtype=jnp.float32)     # BN defaults
    beta = jnp.zeros((Cin,), dtype=jnp.float32)
    w_t = 0.1 * jax.random.normal(k_w, (Cin, Cout, 3, 3), dtype=jnp.float32)
    b_t = 0.1 * jax.random.normal(k_b, (Cout,), dtype=jnp.float32)

    fwd = jax.jit(trans_conv_forward, static_argnames=("matmul_dtype",))

    # Strict-precision path (f32 matmul) and default perf path (bf16 MXU operands).
    out_f32 = jax.block_until_ready(fwd(x, gamma, beta, w_t, b_t, matmul_dtype=jnp.float32))
    out_bf16 = jax.block_until_ready(fwd(x, gamma, beta, w_t, b_t))
    ref = jax.block_until_ready(reference(x, gamma, beta, w_t, b_t))

    assert out_f32.shape == (N, Cout, 2 * H, 2 * W), out_f32.shape
    assert out_bf16.shape == (N, Cout, 2 * H, 2 * W), out_bf16.shape
    err_f32 = float(jnp.max(jnp.abs(out_f32 - ref)))
    err_bf16 = float(jnp.max(jnp.abs(out_bf16 - ref)))
    assert err_f32 < 2e-4, err_f32
    assert err_bf16 < 5e-2, err_bf16
    print("KERNEL_OK")
</pallas_src>

<mosaic_0001>
module attributes {stable_mosaic.version = 11 : i64} {
  func.func @bn_stats_kernel(%arg0: i32, %arg1: memref<1x256x4xf32, #tpu.memory_space<vmem>>, %arg2: memref<2x4xf32, #tpu.memory_space<vmem>>) attributes {dimension_semantics = [#tpu.dimension_semantics<arbitrary>], iteration_bounds = array<i64: 2>, scalar_prefetch = 0 : i64, scratch_operands = 0 : i64, tpu.core_type = #tpu.core_type<tc>, window_params = [{transform_indices = @transform_0, window_bounds = array<i64: 1, 256, 4>}, {pipeline_mode = #tpu.pipeline_mode<synchronous>, transform_indices = @transform_1, window_bounds = array<i64: 2, 4>}]} {
    %c0_i32 = arith.constant 0 : i32
    %0 = arith.cmpi eq, %arg0, %c0_i32 : i32
    %1 = arith.extui %0 : i1 to i32
    %c0_i32_0 = arith.constant 0 : i32
    %2 = arith.cmpi ne, %1, %c0_i32_0 : i32
    scf.if %2 {
      %cst_8 = arith.constant 0.000000e+00 : f32
      %14 = vector.broadcast %cst_8 : f32 to vector<2x4xf32>
      %c0_9 = arith.constant 0 : index
      %c0_10 = arith.constant 0 : index
      %15 = vector.load %arg2[%c0_9, %c0_10] : memref<2x4xf32, #tpu.memory_space<vmem>>, vector<2x4xf32>
      tpu.vector_store %arg2[%c0_9, %c0_10], %14 {strides = array<i32>} : memref<2x4xf32, #tpu.memory_space<vmem>>, vector<2x4xf32>,
    } else {
    }
    %c0 = arith.constant 0 : index
    %c0_1 = arith.constant 0 : index
    %c0_2 = arith.constant 0 : index
    %3 = vector.load %arg1[%c0, %c0_1, %c0_2] : memref<1x256x4xf32, #tpu.memory_space<vmem>>, vector<1x256x4xf32>
    %4 = vector.shape_cast %3 : vector<1x256x4xf32> to vector<256x4xf32>
    %cst = arith.constant dense<0.000000e+00> : vector<4xf32>
    %5 = vector.multi_reduction <add>, %4, %cst [0] : vector<256x4xf32> to vector<4xf32>
    %6 = vector.shape_cast %5 : vector<4xf32> to vector<1x4xf32>
    %7 = arith.mulf %4, %4 : vector<256x4xf32>
    %cst_3 = arith.constant dense<0.000000e+00> : vector<4xf32>
    %8 = vector.multi_reduction <add>, %7, %cst_3 [0] : vector<256x4xf32> to vector<4xf32>
    %9 = vector.shape_cast %8 : vector<4xf32> to vector<1x4xf32>
    %c0_4 = arith.constant 0 : index
    %c0_5 = arith.constant 0 : index
    %10 = vector.load %arg2[%c0_4, %c0_5] : memref<2x4xf32, #tpu.memory_space<vmem>>, vector<2x4xf32>
    %11 = tpu.concatenate %6, %9 in 0 : vector<1x4xf32>, vector<1x4xf32> -> vector<2x4xf32>
    %12 = arith.addf %10, %11 : vector<2x4xf32>
    %c0_6 = arith.constant 0 : index
    %c0_7 = arith.constant 0 : index
    %13 = vector.load %arg2[%c0_6, %c0_7] : memref<2x4xf32, #tpu.memory_space<vmem>>, vector<2x4xf32>
    tpu.vector_store %arg2[%c0_6, %c0_7], %12 {strides = array<i32>} : memref<2x4xf32, #tpu.memory_space<vmem>>, vector<2x4xf32>,
    return
  }
  func.func @transform_0(%arg0: i32) -> (i32, i32, i32) {
    %c0_i32 = arith.constant 0 : i32
    %c0_i32_0 = arith.constant 0 : i32
    %c0_i32_1 = arith.constant 0 : i32
    return %arg0, %c0_i32, %c0_i32_0 : i32, i32, i32
  }
  func.func @transform_1(%arg0: i32) -> (i32, i32) {
    %c0_i32 = arith.constant 0 : i32
    %c0_i32_0 = arith.constant 0 : i32
    %c0_i32_1 = arith.constant 0 : i32
    return %c0_i32, %c0_i32_0 : i32, i32
  }
}

module attributes {stable_mosaic.version = 11 : i64} {
  func.func @transconv_kernel(%arg0: i32, %arg1: memref<1x256x4xf32, #tpu.memory_space<vmem>>, %arg2: memref<1x4xf32, #tpu.memory_space<vmem>>, %arg3: memref<1x4xf32, #tpu.memory_space<vmem>>, %arg4: memref<16x8xf32, #tpu.memory_space<vmem>>, %arg5: memref<1x8xf32, #tpu.memory_space<vmem>>, %arg6: memref<1x256x8xf32, #tpu.memory_space<vmem>>) attributes {dimension_semantics = [#tpu.dimension_semantics<parallel>], iteration_bounds = array<i64: 2>, scalar_prefetch = 0 : i64, scratch_operands = 0 : i64, tpu.core_type = #tpu.core_type<tc>, window_params = [{transform_indices = @transform_0, window_bounds = array<i64: 1, 256, 4>}, {pipeline_mode = #tpu.pipeline_mode<synchronous>, transform_indices = @transform_1, window_bounds = array<i64: 1, 4>}, {pipeline_mode = #tpu.pipeline_mode<synchronous>, transform_indices = @transform_2, window_bounds = array<i64: 1, 4>}, {pipeline_mode = #tpu.pipeline_mode<synchronous>, transform_indices = @transform_3, window_bounds = array<i64: 16, 8>}, {pipeline_mode = #tpu.pipeline_mode<synchronous>, transform_indices = @transform_4, window_bounds = array<i64: 1, 8>}, {transform_indices = @transform_5, window_bounds = array<i64: 1, 256, 8>}]} {
    %c0 = arith.constant 0 : index
    %c0_0 = arith.constant 0 : index
    %c0_1 = arith.constant 0 : index
    %0 = vector.load %arg1[%c0, %c0_0, %c0_1] : memref<1x256x4xf32, #tpu.memory_space<vmem>>, vector<1x256x4xf32>
    %1 = vector.shape_cast %0 : vector<1x256x4xf32> to vector<256x4xf32>
    %c0_2 = arith.constant 0 : index
    %c0_3 = arith.constant 0 : index
    %2 = vector.load %arg2[%c0_2, %c0_3] : memref<1x4xf32, #tpu.memory_space<vmem>>, vector<1x4xf32>
    %3 = vector.broadcast %2 : vector<1x4xf32> to vector<256x4xf32>
    %4 = arith.mulf %1, %3 : vector<256x4xf32>
    %c0_4 = arith.constant 0 : index
    %c0_5 = arith.constant 0 : index
    %5 = vector.load %arg3[%c0_4, %c0_5] : memref<1x4xf32, #tpu.memory_space<vmem>>, vector<1x4xf32>
    %6 = vector.broadcast %5 : vector<1x4xf32> to vector<256x4xf32>
    %7 = arith.addf %4, %6 : vector<256x4xf32>
    %cst = arith.constant 0.000000e+00 : f32
    %8 = vector.broadcast %cst : f32 to vector<256x4xf32>
    %9 = arith.maximumf %7, %8 : vector<256x4xf32>
    %cst_6 = arith.constant 0.000000e+00 : f32
    %10 = vector.broadcast %cst_6 : f32 to vector<1x4xf32>
    %cst_7 = arith.constant 0.000000e+00 : f32
    %11 = vector.broadcast %cst_7 : f32 to vector<16x4xf32>
    %cst_8 = arith.constant 0.000000e+00 : f32
    %12 = vector.broadcast %cst_8 : f32 to vector<17x4xf32>
    %13 = vector.extract_strided_slice %9 {offsets = [1, 0], sizes = [255, 4], strides = [1, 1]} : vector<256x4xf32> to vector<255x4xf32>
    %14 = tpu.concatenate %13, %10 in 0 : vector<255x4xf32>, vector<1x4xf32> -> vector<256x4xf32>
    %15 = vector.extract_strided_slice %9 {offsets = [16, 0], sizes = [240, 4], strides = [1, 1]} : vector<256x4xf32> to vector<240x4xf32>
    %16 = tpu.concatenate %15, %11 in 0 : vector<240x4xf32>, vector<16x4xf32> -> vector<256x4xf32>
    %17 = vector.extract_strided_slice %9 {offsets = [17, 0], sizes = [239, 4], strides = [1, 1]} : vector<256x4xf32> to vector<239x4xf32>
    %18 = tpu.concatenate %17, %12 in 0 : vector<239x4xf32>, vector<17x4xf32> -> vector<256x4xf32>
    %19 = tpu.iota {dimensions = array<i32: 0>} : vector<256x4xi32>
    %c16_i32 = arith.constant 16 : i32
    %c0_i32 = arith.constant 0 : i32
    %20 = arith.cmpi eq, %c16_i32, %c0_i32 : i32
    %c1_i32 = arith.constant 1 : i32
    %21 = arith.select %20, %c1_i32, %c16_i32 : i32
    %22 = vector.broadcast %21 : i32 to vector<256x4xi32>
    %23 = arith.remsi %19, %22 : vector<256x4xi32>
    %c0_i32_9 = arith.constant 0 : i32
    %24 = vector.broadcast %c0_i32_9 : i32 to vector<256x4xi32>
    %25 = arith.cmpi ne, %23, %24 : vector<256x4xi32>
    %c0_i32_10 = arith.constant 0 : i32
    %26 = vector.broadcast %c0_i32_10 : i32 to vector<256x4xi32>
    %27 = arith.cmpi slt, %23, %26 : vector<256x4xi32>
    %c0_i32_11 = arith.constant 0 : i32
    %28 = arith.cmpi slt, %21, %c0_i32_11 : i32
    %29 = vector.broadcast %28 : i1 to vector<256x4xi1>
    %30 = vector.broadcast %29 : vector<256x4xi1> to vector<256x4xi1>
    %31 = arith.xori %27, %30 : vector<256x4xi1>
    %32 = arith.andi %31, %25 : vector<256x4xi1>
    %33 = vector.broadcast %21 : i32 to vector<256x4xi32>
    %34 = arith.addi %23, %33 : vector<256x4xi32>
    %35 = arith.select %32, %34, %23 : vector<256x4xi1>, vector<256x4xi32>
    %c15_i32 = arith.constant 15 : i32
    %36 = vector.broadcast %c15_i32 : i32 to vector<256x4xi32>
    %37 = arith.cmpi slt, %35, %36 : vector<256x4xi32>
    %cst_12 = arith.constant 0.000000e+00 : f32
    %38 = vector.broadcast %cst_12 : f32 to vector<256x4xf32>
    %39 = arith.select %37, %14, %38 : vector<256x4xi1>, vector<256x4xf32>
    %cst_13 = arith.constant 0.000000e+00 : f32
    %40 = vector.broadcast %cst_13 : f32 to vector<256x4xf32>
    %41 = arith.select %37, %18, %40 : vector<256x4xi1>, vector<256x4xf32>
    %42 = tpu.concatenate %9, %39, %16, %41 in 1 : vector<256x4xf32>, vector<256x4xf32>, vector<256x4xf32>, vector<256x4xf32> -> vector<256x16xf32>
    %c0_14 = arith.constant 0 : index
    %c0_15 = arith.constant 0 : index
    %43 = vector.load %arg4[%c0_14, %c0_15] : memref<16x8xf32, #tpu.memory_space<vmem>>, vector<16x8xf32>
    %cst_16 = arith.constant dense<0.000000e+00> : vector<256x8xf32>
    %44 = tpu.matmul %42, %43, %cst_16 {dimension_numbers = #tpu.dot_dimension_numbers<[1], [0], [0], [1], [0, 0, 1, 1], [], []>} : vector<256x16xf32>, vector<16x8xf32>, vector<256x8xf32> -> vector<256x8xf32>
    %c0_17 = arith.constant 0 : index
    %c0_18 = arith.constant 0 : index
    %45 = vector.load %arg5[%c0_17, %c0_18] : memref<1x8xf32, #tpu.memory_space<vmem>>, vector<1x8xf32>
    %46 = vector.broadcast %45 : vector<1x8xf32> to vector<256x8xf32>
    %47 = arith.addf %44, %46 : vector<256x8xf32>
    %c0_19 = arith.constant 0 : index
    %c0_20 = arith.constant 0 : index
    %c0_21 = arith.constant 0 : index
    %48 = vector.load %arg6[%c0_19, %c0_20, %c0_21] : memref<1x256x8xf32, #tpu.memory_space<vmem>>, vector<1x256x8xf32>
    %49 = vector.shape_cast %48 : vector<1x256x8xf32> to vector<256x8xf32>
    %50 = vector.shape_cast %47 : vector<256x8xf32> to vector<1x256x8xf32>
    tpu.vector_store %arg6[%c0_19, %c0_20, %c0_21], %50 {strides = array<i32>} : memref<1x256x8xf32, #tpu.memory_space<vmem>>, vector<1x256x8xf32>,
    return
  }
  func.func @transform_0(%arg0: i32) -> (i32, i32, i32) {
    %c0_i32 = arith.constant 0 : i32
    %c0_i32_0 = arith.constant 0 : i32
    %c0_i32_1 = arith.constant 0 : i32
    return %arg0, %c0_i32, %c0_i32_0 : i32, i32, i32
  }
  func.func @transform_1(%arg0: i32) -> (i32, i32) {
    %c0_i32 = arith.constant 0 : i32
    %c0_i32_0 = arith.constant 0 : i32
    %c0_i32_1 = arith.constant 0 : i32
    return %c0_i32, %c0_i32_0 : i32, i32
  }
  func.func @transform_2(%arg0: i32) -> (i32, i32) {
    %c0_i32 = arith.constant 0 : i32
    %c0_i32_0 = arith.constant 0 : i32
    %c0_i32_1 = arith.constant 0 : i32
    return %c0_i32, %c0_i32_0 : i32, i32
  }
  func.func @transform_3(%arg0: i32) -> (i32, i32) {
    %c0_i32 = arith.constant 0 : i32
    %c0_i32_0 = arith.constant 0 : i32
    %c0_i32_1 = arith.constant 0 : i32
    return %c0_i32, %c0_i32_0 : i32, i32
  }
  func.func @transform_4(%arg0: i32) -> (i32, i32) {
    %c0_i32 = arith.constant 0 : i32
    %c0_i32_0 = arith.constant 0 : i32
    %c0_i32_1 = arith.constant 0 : i32
    return %c0_i32, %c0_i32_0 : i32, i32
  }
  func.func @transform_5(%arg0: i32) -> (i32, i32, i32) {
    %c0_i32 = arith.constant 0 : i32
    %c0_i32_0 = arith.constant 0 : i32
    %c0_i32_1 = arith.constant 0 : i32
    return %arg0, %c0_i32, %c0_i32_0 : i32, i32, i32
  }
}

</mosaic_0001>

<bundles_post_ra>
// kernel: tile.8
= control target key start
LH: loop header
LB: loop body
LE: loop exit
PB: predicated region body
PF: predicated region fallthrough
CT: control target
= control target key end

     0   :  { %s22_s0 = inlined_call_operand.vmem [shape: f32[2], index: 0, kind: input, shape index: {}]   ;;  %s23_s1 = inlined_call_operand.vmem [shape: f32[4,2], index: 1, kind: output, shape index: {}]  }
   0x1   :  { %v4_v0 = vld [vmem:[%s22_s0] ss:$0 sm:$0xff] }
   0x2   :  { %5 = vst [vmem:[%s23_s1] sm:$0xf] %v4_v0 }

// kernel: tile.9
= control target key start
LH: loop header
LB: loop body
LE: loop exit
PB: predicated region body
PF: predicated region fallthrough
CT: control target
= control target key end

     0   :  { %vm8_vm0 = vcmask 15360   ;;  %s40_s8 = smov 2   ;;  %s41_s9 = smov 4   ;;  %vm14_vm1 = vcmask 64560   ;;  %vm20_vm2 = vcmask 48160   ;;  %vm26_vm3 = vcmask 31760   ;;  %s58_s0 = inlined_call_operand.vmem [shape: f32[4,2], index: 0, kind: input, shape index: {}]   ;;  %s59_s1 = inlined_call_operand.vmem [shape: f32[1,8], index: 1, kind: output, shape index: {}]  }
   0x1   :  { %v5_v0 = vld [vmem:[%s58_s0] sm:$0xf]  ;;  %s39_s0 = smov 6  }
   0x2   :  { %6 = vst [vmem:[#allocation1] sm:$0xf] %v5_v0 }
   0x9   :  { %v11_v1 = vld [vmem:[#allocation1 + $0x3] sm:$0x1]   ;;  %v23_v2 = vld [vmem:[#allocation1 + $0x1] sm:$0x1]   ;;  %v7_v3 = vld [vmem:[#allocation1] sm:$0x1]  }
   0xa   :  { %12 = vrot.lane.b32.xlu0 %v11_v1, %s39_s0  ;;  %24 = vrot.lane.b32.xlu1 %v23_v2, %s40_s8  ;;  %v17_v4 = vld [vmem:[#allocation1 + $0x2] sm:$0x1]   ;;  %9 = vst.msk [vmem:[#allocation0] sm:$0x1] %vm8_vm0, %v7_v3  }
   0xe   :  { %18 = vrot.lane.b32.xlu0 %v17_v4, %s41_s9 }
  0x7c   :  { %v13_v5 = vpop.permute.xlu0 %12   ;;  %v25_v6 = vpop.permute.xlu1 %24  }
  0x7d   :  { %15 = vst.msk [vmem:[#allocation0] sm:$0x1] %vm14_vm1, %v13_v5  }
  0x80   :  { %v19_v7 = vpop.permute.xlu0 %18  }
  0x81   :  { %21 = vst.msk [vmem:[#allocation0] sm:$0x1] %vm20_vm2, %v19_v7  }
  0x82   :  { %27 = vst.msk [vmem:[#allocation0] sm:$0x1] %vm26_vm3, %v25_v6  }
  0x89   :  { %v32_v8 = vld [vmem:[#allocation0] sm:$0x1] }
  0x8a   :  { %35 = vst [vmem:[%s59_s1] sm:$0x1] %v32_v8 }

// kernel: trans_conv_forward.2
= control target key start
LH: loop header
LB: loop body
LE: loop exit
PB: predicated region body
PF: predicated region fallthrough
CT: control target
= control target key end

     0   :  { %s383_s6 = smov 0   ;;  %s504_s0 = inlined_call_operand.vmem [shape: f32[2,256,4], index: 0, kind: input, shape index: {}]   ;;  %s505_s1 = inlined_call_operand.vmem [shape: f32[2,4], index: 1, kind: output, shape index: {}]  }
   0x1 LB: > { %s345_s7 = sadd.s32 4294967295, %s370_s6   ;;  %p348_p0 = scmp.ge.s32.totalorder %s370_s6, 1  ;;  %s370_s6 = sphi %s383_s6, %s11_s6  }
   0x2   : > { %p82_p1 = scmp.lt.s32.totalorder %s370_s6, 3 }
   0x4   : > { %p83_p2 = pnand %p348_p0, %p82_p1 }
   0x5   : > { %p97_p3 = scmp.lt.s32.totalorder (!%p83_p2), %s345_s7, 1  ;;  %p351_p4 = scmp.ne.s32.totalorder (!%p83_p2), %s345_s7, 0 }
   0x6   : > { %86 = sbr.rel (%p83_p2) target bundleno = 104 (0x68), region = 24 }
   0xb   : > { %s98_s8 = scalar_select %p97_p3, %s345_s7, 1 }
   0xc   : > { %105 = sbr.rel (%p351_p4) target bundleno = 19 (0x13), region = 28 }
   0xd   : > { %s354_s9 = sshll.u32 %s98_s8, 8 }
   0xe   : > { %s394_s12 = scalar_lea.vmem %s504_s0, %s354_s9 }
  0x11   : > { %vm106_vm0 = vcmask 25600   ;;  %v372_v0 = vmov 0.0  }
  0x12   : > { %107 = vst.msk [vmem:[%s505_s1] sm:$0x3] %vm106_vm0, %v372_v0 }
  0x13 PF: > { %v108_v1 = vld [vmem:[%s394_s12] sm:$0xff]  ;;  %v109_v2 = vld [vmem:[%s394_s12 + $0x8] sm:$0xff]  ;;  %v110_v3 = vld [vmem:[%s394_s12 + $0x10] sm:$0xff]  ;;  %vm140_vm1 = vcmask 31744   ;;  %vm312_vm2 = vcmask 1040384   ;;  %vm315_vm3 = vcmask 25600  }
  0x14   : > { %v141_v4 = vsel %vm140_vm1, %v108_v1, 0.0  ;;  %v142_v5 = vsel %vm140_vm1, %v109_v2, 0.0  ;;  %v144_v6 = vsel %vm140_vm1, %v110_v3, 0.0  ;;  %v111_v7 = vld [vmem:[%s394_s12 + $0x18] sm:$0xff]  ;;  %v112_v10 = vld [vmem:[%s394_s12 + $0x20] sm:$0xff]  ;;  %v113_v13 = vld [vmem:[%s394_s12 + $0x28] sm:$0xff]  ;;  %v210_v28 = vmul.f32 %v108_v1, %v108_v1 }
  0x15   : > { %v143_v8 = vadd.f32 %v142_v5, %v141_v4  ;;  %v146_v9 = vsel %vm140_vm1, %v111_v7, 0.0  ;;  %v148_v12 = vsel %vm140_vm1, %v112_v10, 0.0  ;;  %v150_v15 = vsel %vm140_vm1, %v113_v13, 0.0  ;;  %v114_v16 = vld [vmem:[%s394_s12 + $0x30] sm:$0xff]  ;;  %v115_v19 = vld [vmem:[%s394_s12 + $0x38] sm:$0xff]  ;;  %v116_v22 = vld [vmem:[%s394_s12 + $0x40] sm:$0xff] }
  0x16   : > { %v152_v18 = vsel %vm140_vm1, %v114_v16, 0.0  ;;  %v154_v21 = vsel %vm140_vm1, %v115_v19, 0.0  ;;  %v156_v24 = vsel %vm140_vm1, %v116_v22, 0.0  ;;  %v117_v25 = vld [vmem:[%s394_s12 + $0x48] sm:$0xff]  ;;  %v211_v29 = vmul.f32 %v109_v2, %v109_v2  ;;  %v118_v31 = vld [vmem:[%s394_s12 + $0x50] sm:$0xff]  ;;  %v119_v33 = vld [vmem:[%s394_s12 + $0x58] sm:$0xff] }
  0x17   : > { %v145_v11 = vadd.f32 %v144_v6, %v143_v8  ;;  %v158_v27 = vsel %vm140_vm1, %v117_v25, 0.0  ;;  %v212_v30 = vmul.f32 %v110_v3, %v110_v3  ;;  %v160_v34 = vsel %vm140_vm1, %v118_v31, 0.0  ;;  %v120_v42 = vld [vmem:[%s394_s12 + $0x60] sm:$0xff]  ;;  %v121_v48 = vld [vmem:[%s394_s12 + $0x68] sm:$0xff]  ;;  %v122_v54 = vld [vmem:[%s394_s12 + $0x70] sm:$0xff] }
  0x18   : > { %v213_v35 = vmul.f32 %v111_v7, %v111_v7  ;;  %v162_v37 = vsel %vm140_vm1, %v119_v33, 0.0  ;;  %v214_v38 = vmul.f32 %v112_v10, %v112_v10  ;;  %v242_v39 = vsel %vm140_vm1, %v210_v28, 0.0  ;;  %v123_v60 = vld [vmem:[%s394_s12 + $0x78] sm:$0xff]  ;;  %v124_v2 = vld [vmem:[%s394_s12 + $0x80] sm:$0xff]  ;;  %v125_v8 = vld [vmem:[%s394_s12 + $0x88] sm:$0xff] }
  0x19   : > { %v147_v14 = vadd.f32 %v146_v9, %v145_v11  ;;  %v243_v40 = vsel %vm140_vm1, %v211_v29, 0.0  ;;  %v245_v41 = vsel %vm140_vm1, %v212_v30, 0.0  ;;  %v164_v45 = vsel %vm140_vm1, %v120_v42, 0.0 }
  0x1a   : > { %v244_v44 = vadd.f32 %v243_v40, %v242_v39  ;;  %v215_v46 = vmul.f32 %v113_v13, %v113_v13  ;;  %v247_v47 = vsel %vm140_vm1, %v213_v35, 0.0  ;;  %v166_v51 = vsel %vm140_vm1, %v121_v48, 0.0 }
  0x1b   : > { %v149_v17 = vadd.f32 %v148_v12, %v147_v14  ;;  %v216_v52 = vmul.f32 %v114_v16, %v114_v16  ;;  %v249_v53 = vsel %vm140_vm1, %v214_v38, 0.0  ;;  %v168_v57 = vsel %vm140_vm1, %v122_v54, 0.0  ;;  %v126_v14 = vld [vmem:[%s394_s12 + $0x90] sm:$0xff] }
  0x1c   : > { %v246_v50 = vadd.f32 %v245_v41, %v244_v44  ;;  %v217_v58 = vmul.f32 %v115_v19, %v115_v19  ;;  %v251_v59 = vsel %vm140_vm1, %v215_v46, 0.0  ;;  %v170_v63 = vsel %vm140_vm1, %v123_v60, 0.0  ;;  %v130_v38 = vld [vmem:[%s394_s12 + $0xb0] sm:$0xff]  ;;  %v131_v44 = vld [vmem:[%s394_s12 + $0xb8] sm:$0xff] }
  0x1d   : > { %v151_v20 = vadd.f32 %v150_v15, %v149_v17  ;;  %v218_v0 = vmul.f32 %v116_v22, %v116_v22  ;;  %v253_v1 = vsel %vm140_vm1, %v216_v52, 0.0  ;;  %v172_v5 = vsel %vm140_vm1, %v124_v2, 0.0 }
  0x1e   : > { %v248_v56 = vadd.f32 %v247_v47, %v246_v50  ;;  %v219_v6 = vmul.f32 %v117_v25, %v117_v25  ;;  %v255_v7 = vsel %vm140_vm1, %v217_v58, 0.0  ;;  %v174_v11 = vsel %vm140_vm1, %v125_v8, 0.0  ;;  %v132_v50 = vld [vmem:[%s394_s12 + $0xc0] sm:$0xff] }
  0x1f   : > { %v153_v23 = vadd.f32 %v152_v18, %v151_v20  ;;  %v220_v12 = vmul.f32 %v118_v31, %v118_v31  ;;  %v257_v13 = vsel %vm140_vm1, %v218_v0, 0.0  ;;  %v176_v17 = vsel %vm140_vm1, %v126_v14, 0.0  ;;  %v127_v20 = vld [vmem:[%s394_s12 + $0x98] sm:$0xff] }
  0x20   : > { %v250_v62 = vadd.f32 %v249_v53, %v248_v56  ;;  %v221_v18 = vmul.f32 %v119_v33, %v119_v33  ;;  %v259_v19 = vsel %vm140_vm1, %v219_v6, 0.0  ;;  %v223_v30 = vmul.f32 %v121_v48, %v121_v48  ;;  %v133_v56 = vld [vmem:[%s394_s12 + $0xc8] sm:$0xff] }
  0x21   : > { %v155_v26 = vadd.f32 %v154_v21, %v153_v23  ;;  %v178_v23 = vsel %vm140_vm1, %v127_v20, 0.0  ;;  %v261_v25 = vsel %vm140_vm1, %v220_v12, 0.0  ;;  %v184_v41 = vsel %vm140_vm1, %v130_v38, 0.0 }
  0x22   : > { %v252_v4 = vadd.f32 %v251_v59, %v250_v62  ;;  %v263_v31 = vsel %vm140_vm1, %v221_v18, 0.0  ;;  %v186_v47 = vsel %vm140_vm1, %v131_v44, 0.0  ;;  %v226_v48 = vmul.f32 %v124_v2, %v124_v2  ;;  %v134_v62 = vld [vmem:[%s394_s12 + $0xd0] sm:$0xff] }
  0x23   : > { %v157_v32 = vadd.f32 %v156_v24, %v155_v26  ;;  %v222_v24 = vmul.f32 %v120_v42, %v120_v42  ;;  %v128_v26 = vld [vmem:[%s394_s12 + $0xa0] sm:$0xff]  ;;  %v225_v42 = vmul.f32 %v123_v60, %v123_v60  ;;  %v188_v53 = vsel %vm140_vm1, %v132_v50, 0.0 }
  0x24   : > { %v254_v10 = vadd.f32 %v253_v1, %v252_v4  ;;  %v180_v29 = vsel %vm140_vm1, %v128_v26, 0.0  ;;  %v190_v59 = vsel %vm140_vm1, %v133_v56, 0.0  ;;  %v228_v60 = vmul.f32 %v126_v14, %v126_v14  ;;  %v135_v4 = vld [vmem:[%s394_s12 + $0xd8] sm:$0xff] }
  0x25   : > { %v159_v36 = vadd.f32 %v158_v27, %v157_v32  ;;  %v129_v32 = vld [vmem:[%s394_s12 + $0xa8] sm:$0xff]  ;;  %v192_v1 = vsel %vm140_vm1, %v134_v62, 0.0  ;;  %v229_v2 = vmul.f32 %v127_v20, %v127_v20  ;;  %v232_v20 = vmul.f32 %v130_v38, %v130_v38 }
  0x26   : > { %v256_v16 = vadd.f32 %v255_v7, %v254_v10  ;;  %v182_v35 = vsel %vm140_vm1, %v129_v32, 0.0  ;;  %v194_v7 = vsel %vm140_vm1, %v135_v4, 0.0  ;;  %v136_v10 = vld [vmem:[%s394_s12 + $0xe0] sm:$0xff]  ;;  %v231_v14 = vmul.f32 %v129_v32, %v129_v32 }
  0x27   : > { %v161_v43 = vadd.f32 %v160_v34, %v159_v36  ;;  %v224_v36 = vmul.f32 %v122_v54, %v122_v54  ;;  %v227_v54 = vmul.f32 %v125_v8, %v125_v8  ;;  %v230_v8 = vmul.f32 %v128_v26, %v128_v26  ;;  %v138_v26 = vld [vmem:[%s394_s12 + $0xf0] sm:$0xff] }
  0x28   : > { %v258_v22 = vadd.f32 %v257_v13, %v256_v16  ;;  %v196_v13 = vsel %vm140_vm1, %v136_v10, 0.0  ;;  %v137_v16 = vld [vmem:[%s394_s12 + $0xe8] sm:$0xff] }
  0x29   : > { %v163_v49 = vadd.f32 %v162_v37, %v161_v43  ;;  %v265_v37 = vsel %vm140_vm1, %v222_v24, 0.0  ;;  %v267_v43 = vsel %vm140_vm1, %v223_v30, 0.0  ;;  %v233_v24 = vmul.f32 %v131_v44, %v131_v44 }
  0x2a   : > { %v260_v28 = vadd.f32 %v259_v19, %v258_v22  ;;  %v198_v19 = vsel %vm140_vm1, %v137_v16, 0.0  ;;  %v234_v30 = vmul.f32 %v132_v50, %v132_v50 }
  0x2b   : > { %v165_v55 = vadd.f32 %v164_v45, %v163_v49  ;;  %v269_v49 = vsel %vm140_vm1, %v224_v36, 0.0 }
  0x2c   : > { %v262_v34 = vadd.f32 %v261_v25, %v260_v28  ;;  %v283_v25 = vsel %vm140_vm1, %v231_v14, 0.0 }
  0x2d   : > { %v167_v61 = vadd.f32 %v166_v51, %v165_v55  ;;  %v271_v55 = vsel %vm140_vm1, %v225_v42, 0.0  ;;  %v237_v42 = vmul.f32 %v135_v4, %v135_v4 }
  0x2e   : > { %v264_v40 = vadd.f32 %v263_v31, %v262_v34  ;;  %v285_v31 = vsel %vm140_vm1, %v232_v20, 0.0  ;;  %v287_v34 = vsel %vm140_vm1, %v233_v24, 0.0 }
  0x2f   : > { %v169_v3 = vadd.f32 %v168_v57, %v167_v61  ;;  %v273_v61 = vsel %vm140_vm1, %v226_v48, 0.0  ;;  %v295_v50 = vsel %vm140_vm1, %v237_v42, 0.0 }
  0x30   : > { %v266_v46 = vadd.f32 %v265_v37, %v264_v40  ;;  %v289_v40 = vsel %vm140_vm1, %v234_v30, 0.0 }
  0x31   : > { %v171_v9 = vadd.f32 %v170_v63, %v169_v3  ;;  %v275_v3 = vsel %vm140_vm1, %v227_v54, 0.0 }
  0x32   : > { %v268_v52 = vadd.f32 %v267_v43, %v266_v46  ;;  %v238_v46 = vmul.f32 %v136_v10, %v136_v10 }
  0x33   : > { %v173_v15 = vadd.f32 %v172_v5, %v171_v9  ;;  %v277_v9 = vsel %vm140_vm1, %v228_v60, 0.0 }
  0x34   : > { %v270_v58 = vadd.f32 %v269_v49, %v268_v52  ;;  %v239_v49 = vmul.f32 %v137_v16, %v137_v16  ;;  %v297_v54 = vsel %vm140_vm1, %v238_v46, 0.0 }
  0x35   : > { %v175_v21 = vadd.f32 %v174_v11, %v173_v15  ;;  %v279_v15 = vsel %vm140_vm1, %v229_v2, 0.0 }
  0x36   : > { %v272_v0 = vadd.f32 %v271_v55, %v270_v58 }
  0x37   : > { %v177_v27 = vadd.f32 %v176_v17, %v175_v21  ;;  %v281_v21 = vsel %vm140_vm1, %v230_v8, 0.0 }
  0x38   : > { %v274_v6 = vadd.f32 %v273_v61, %v272_v0 }
  0x39   : > { %v179_v33 = vadd.f32 %v178_v23, %v177_v27 }
  0x3a   : > { %v276_v12 = vadd.f32 %v275_v3, %v274_v6 }
  0x3b   : > { %v181_v39 = vadd.f32 %v180_v29, %v179_v33  ;;  %v200_v29 = vsel %vm140_vm1, %v138_v26, 0.0  ;;  %v235_v33 = vmul.f32 %v133_v56, %v133_v56 }
  0x3c   : > { %v278_v18 = vadd.f32 %v277_v9, %v276_v12 }
  0x3d   : > { %v183_v45 = vadd.f32 %v182_v35, %v181_v39  ;;  %v139_v35 = vld [vmem:[%s394_s12 + $0xf8] sm:$0xff]  ;;  %v236_v39 = vmul.f32 %v134_v62, %v134_v62  ;;  %v291_v43 = vsel %vm140_vm1, %v235_v33, 0.0 }
  0x3e   : > { %v280_v23 = vadd.f32 %v279_v15, %v278_v18  ;;  %v202_v38 = vsel %vm140_vm1, %v139_v35, 0.0  ;;  %v241_v56 = vmul.f32 %v139_v35, %v139_v35 }
  0x3f   : > { %v185_v51 = vadd.f32 %v184_v41, %v183_v45 }
  0x40   : > { %v282_v28 = vadd.f32 %v281_v21, %v280_v23  ;;  %v303_v62 = vsel %vm140_vm1, %v241_v56, 0.0 }
  0x41   : > { %v187_v57 = vadd.f32 %v186_v47, %v185_v51  ;;  %v293_v47 = vsel %vm140_vm1, %v236_v39, 0.0 }
  0x42   : > { %v284_v32 = vadd.f32 %v283_v25, %v282_v28 }
  0x43   : > { %v189_v63 = vadd.f32 %v188_v53, %v187_v57  ;;  %v240_v53 = vmul.f32 %v138_v26, %v138_v26  ;;  %v299_v57 = vsel %vm140_vm1, %v239_v49, 0.0 }
  0x44   : > { %v286_v37 = vadd.f32 %v285_v31, %v284_v32 }
  0x45   : > { %v191_v5 = vadd.f32 %v190_v59, %v189_v63  ;;  %v301_v60 = vsel %vm140_vm1, %v240_v53, 0.0 }
  0x46   : > { %v288_v41 = vadd.f32 %v287_v34, %v286_v37 }
  0x47   : > { %v193_v11 = vadd.f32 %v192_v1, %v191_v5 }
  0x48   : > { %v290_v45 = vadd.f32 %v289_v40, %v288_v41 }
  0x49   : > { %v195_v17 = vadd.f32 %v194_v7, %v193_v11  ;;  %v311_v11 = vld [vmem:[%s505_s1] sm:$0x3] }
  0x4a   : > { %v292_v48 = vadd.f32 %v291_v43, %v290_v45 }
  0x4b   : > { %v197_v22 = vadd.f32 %v196_v13, %v195_v17 }
  0x4c   : > { %v294_v52 = vadd.f32 %v293_v47, %v292_v48 }
  0x4d   : > { %v199_v27 = vadd.f32 %v198_v19, %v197_v22 }
  0x4e   : > { %v296_v55 = vadd.f32 %v295_v50, %v294_v52 }
  0x4f   : > { %v201_v36 = vadd.f32 %v200_v29, %v199_v27 }
  0x50   : > { %v298_v59 = vadd.f32 %v297_v54, %v296_v55 }
  0x51   : > { %v203_v44 = vadd.f32 %v202_v38, %v201_v36 }
  0x52   : > { %v300_v61 = vadd.f32 %v299_v57, %v298_v59 }
  0x53   : > { %v204_v51 = vrot.slane %v203_v44, 4 }
  0x54   : > { %v302_v0 = vadd.f32 %v301_v60, %v300_v61 }
  0x55   : > { %v205_v58 = vadd.f32 %v204_v51, %v203_v44 }
  0x56   : > { %v304_v1 = vadd.f32 %v303_v62, %v302_v0 }
  0x57   : > { %v206_v63 = vrot.slane %v205_v58, 2 }
  0x58   : > { %v305_v3 = vrot.slane %v304_v1, 4 }
  0x59   : > { %v207_v2 = vadd.f32 %v206_v63, %v205_v58 }
  0x5a   : > { %v306_v4 = vadd.f32 %v305_v3, %v304_v1 }
  0x5b   : > { %v208_v5 = vrot.slane %v207_v2, 1 }
  0x5c   : > { %v307_v6 = vrot.slane %v306_v4, 2 }
  0x5d   : > { %v209_v8 = vadd.f32 %v208_v5, %v207_v2 }
  0x5e   : > { %v308_v7 = vadd.f32 %v307_v6, %v306_v4 }
  0x60   : > { %v309_v9 = vrot.slane %v308_v7, 1 }
  0x62   : > { %v310_v10 = vadd.f32 %v309_v9, %v308_v7 }
  0x64   : > { %v313_v12 = vsel %vm312_vm2, %v209_v8, %v310_v10 }
  0x65   : > { %v314_v13 = vadd.f32 %v313_v12, %v311_v11 }
  0x67   : > { %316 = vst.msk [vmem:[%s505_s1] sm:$0x3] %vm315_vm3, %v314_v13 }
  0x68 PF: > { %s11_s6 = sadd.s32 1, %s370_s6  }
  0x69   : > { %p8_p5 = scmp.ge.s32.totalorder %s11_s6, 4  }
  0x6b   :  { %10 = sbr.rel (!%p8_p5) target bundleno = 1 (0x1), region = 54 }

// kernel: trans_conv_forward.3
= control target key start
LH: loop header
LB: loop body
LE: loop exit
PB: predicated region body
PF: predicated region fallthrough
CT: control target
= control target key end

     0   :  { %s2061_s18 = smov 0   ;;  %s3095_s0 = inlined_call_operand.vmem [shape: f32[2,256,4], index: 0, kind: input, shape index: {}]   ;;  %s3096_s1 = inlined_call_operand.vmem [shape: f32[1,4], index: 1, kind: input, shape index: {}]   ;;  %s3097_s2 = inlined_call_operand.vmem [shape: f32[1,4], index: 2, kind: input, shape index: {}]   ;;  %s3098_s3 = inlined_call_operand.vmem [shape: f32[16,8], index: 3, kind: input, shape index: {}]   ;;  %s3099_s4 = inlined_call_operand.vmem [shape: f32[1,8], index: 4, kind: input, shape index: {}]   ;;  %s3100_s5 = inlined_call_operand.vmem [shape: f32[2,256,8], index: 5, kind: output, shape index: {}]  }
   0x1 LB: > { %s1869_s19 = sadd.s32 4294967295, %s2025_s18   ;;  %p1873_p0 = scmp.ge.s32.totalorder %s2025_s18, 1  ;;  %s2025_s18 = sphi %s2061_s18, %s15_s18  }
   0x2   : > { %p187_p1 = scmp.lt.s32.totalorder %s2025_s18, 3 }
   0x4   : > { %p188_p2 = pnand %p1873_p0, %p187_p1 }
   0x6   : > { %191 = sbr.rel (%p188_p2) target bundleno = 523 (0x20b), region = 40 }
   0xb   : > { %p215_p3 = scmp.lt.s32.totalorder %s1869_s19, 1  ;;  %v496_v0 = vlaneseq  ;;  %v2075_v1 = vld [vmem:[%s3096_s1] ss:$0 sm:$0xff]  ;;  %s2027_s28 = smov 8   ;;  %vm399_vm0 = vcmask 1046528   ;;  %v1452_v48 = vld [vmem:[%s3098_s3 + $0x8] sm:$0xff] }
   0xc   : > { %v2089_v3 = vld [vmem:[%s3097_s2] ss:$0 sm:$0xff]  ;;  %1951 = vmatprep.subr.mxu0 %v1452_v48  ;;  %2003 = vmatprep.subr.mxu1 %v1452_v48  ;;  %s2028_s8 = smov 12   ;;  %s2029_s9 = smov 4  }
   0xd   : > { %s3197_s19 = smov (!%p215_p3, %s1869_s19), 1  ;;  %v2077_v2 = vshrl.u32 %v496_v0, 7  ;;  %v1451_v56 = vld [vmem:[%s3098_s3] sm:$0xff]  ;;  %1952 = vmatpush3.msra.mxu0 %v1452_v48  ;;  %2005 = vmatpush3.msra.mxu1 %v1452_v48 }
   0xe   : > { %s1915_s20 = sshll.u32 %s3197_s19, 8  ;;  %1953 = vmatprep.subr.mxu0 %v1451_v56  ;;  %2004 = vmatprep.subr.mxu1 %v1451_v56 }
   0xf   : > { %s2084_s25 = scalar_lea.vmem %s3095_s0, %s1915_s20  ;;  %v498_v16 = vadd.s32 8, %v2077_v2  ;;  %v514_v45 = vadd.s32 136, %v2077_v2  ;;  %1954 = vmatpush3.msra.mxu0 %v1451_v56  ;;  %2006 = vmatpush3.msra.mxu1 %v1451_v56  ;;  %s2994_s14 = scalar_lea.vmem %s3100_s5, %s1915_s20 }
  0x10   : > { %v243_v4 = vld [vmem:[%s2084_s25 + $0x90] sm:$0xff]  ;;  %v244_v6 = vld [vmem:[%s2084_s25 + $0x98] sm:$0xff]  ;;  %v225_v11 = vld [vmem:[%s2084_s25] sm:$0xff] }
  0x11   : > { %v227_v5 = vld [vmem:[%s2084_s25 + $0x10] sm:$0xff]  ;;  %v282_v7 = vmul.f32 %v2075_v1, %v243_v4  ;;  %v283_v9 = vmul.f32 %v2075_v1, %v244_v6  ;;  %v228_v10 = vld [vmem:[%s2084_s25 + $0x18] sm:$0xff]  ;;  %v226_v12 = vld [vmem:[%s2084_s25 + $0x8] sm:$0xff]  ;;  %v264_v14 = vmul.f32 %v2075_v1, %v225_v11  ;;  %v540_v44 = vand.u32 15, %v498_v16 }
  0x12   : > { %v266_v8 = vmul.f32 %v2075_v1, %v227_v5  ;;  %v267_v13 = vmul.f32 %v2075_v1, %v228_v10  ;;  %v265_v15 = vmul.f32 %v2075_v1, %v226_v12  ;;  %v241_v17 = vld [vmem:[%s2084_s25 + $0x80] sm:$0xff]  ;;  %v242_v18 = vld [vmem:[%s2084_s25 + $0x88] sm:$0xff]  ;;  %v652_v59 = vand.u32 15, %v514_v45  ;;  %v247_v61 = vld [vmem:[%s2084_s25 + $0xb0] sm:$0xff] }
  0x13   : > { %v321_v19 = vadd.f32 %v2089_v3, %v282_v7  ;;  %v322_v21 = vadd.f32 %v2089_v3, %v283_v9  ;;  %v280_v22 = vmul.f32 %v2075_v1, %v241_v17  ;;  %v2112_v24 = vadd.f32 %v2089_v3, %v264_v14  ;;  %v245_v34 = vld [vmem:[%s2084_s25 + $0xa0] sm:$0xff]  ;;  %v246_v51 = vld [vmem:[%s2084_s25 + $0xa8] sm:$0xff]  ;;  %v231_v62 = vld [vmem:[%s2084_s25 + $0x30] sm:$0xff] }
  0x14   : > { %v305_v20 = vadd.f32 %v2089_v3, %v266_v8  ;;  %v306_v23 = vadd.f32 %v2089_v3, %v267_v13  ;;  %v2115_v25 = vadd.f32 %v2089_v3, %v265_v15  ;;  %v281_v26 = vmul.f32 %v2075_v1, %v242_v18  ;;  %v229_v38 = vld [vmem:[%s2084_s25 + $0x20] sm:$0xff]  ;;  %v230_v7 = vld [vmem:[%s2084_s25 + $0x28] sm:$0xff]  ;;  %v251_v56 = vld [vmem:[%s2084_s25 + $0xd0] sm:$0xff] }
  0x15   : > { %v2118_v27 = vmax.f32 %v321_v19, 0.0  ;;  %v2122_v29 = vmax.f32 %v322_v21, 0.0  ;;  %v319_v30 = vadd.f32 %v2089_v3, %v280_v22  ;;  %v3102_v31 = vmax.f32 %v2112_v24, 0.0  ;;  %v249_v18 = vld [vmem:[%s2084_s25 + $0xc0] sm:$0xff]  ;;  %v250_v48 = vld [vmem:[%s2084_s25 + $0xc8] sm:$0xff] }
  0x16   : > { %v2120_v28 = vmax.f32 %v305_v20, 0.0  ;;  %v3101_v32 = vmax.f32 %v2115_v25, 0.0  ;;  %v320_v33 = vadd.f32 %v2089_v3, %v281_v26  ;;  %v2133_v35 = vmax.f32 %v306_v23, 0.0  ;;  %v233_v19 = vld [vmem:[%s2084_s25 + $0x40] sm:$0xff] }
  0x17   : > { %1168 = vrot.lane.b32.xlu1 %v2118_v27, %s2027_s28  ;;  %v435_v36 = vrot.slane %v2118_v27, 1  ;;  %v437_v37 = vrot.slane %v2122_v29, 1  ;;  %v400_v39 = vrot.slane %v3102_v31, 1  ;;  %v2142_v41 = vmax.f32 %v319_v30, 0.0 }
  0x18   : > { %1136 = vrot.lane.b32.xlu0 %v2120_v28, %s2027_s28  ;;  %v401_v40 = vrot.slane %v3101_v32, 1  ;;  %v2144_v42 = vmax.f32 %v320_v33, 0.0  ;;  %v403_v43 = vrot.slane %v2120_v28, 1  ;;  %v284_v46 = vmul.f32 %v2075_v1, %v245_v34  ;;  %v238_v32 = vld [vmem:[%s2084_s25 + $0x68] sm:$0xff] }
  0x19   : > { %v268_v47 = vmul.f32 %v2075_v1, %v229_v38  ;;  %v2160_v49 = vsel %vm399_vm0, %v435_v36, %v437_v37  ;;  %v3113_v53 = vrot.slane %v2142_v41, 1  ;;  %vm2172_vm1 = vcmp.lt.s32.totalorder %v540_v44, 15 }
  0x1a   : > { %v323_v50 = vadd.f32 %v2089_v3, %v284_v46  ;;  %v402_v52 = vsel %vm399_vm0, %v400_v39, %v401_v40  ;;  %v433_v54 = vrot.slane %v2144_v42, 1  ;;  %v404_v57 = vsel %vm399_vm0, %v401_v40, %v403_v43 }
  0x1b   : > { %1170 = vrot.lane.b32.xlu1 %v2122_v29, %s2027_s28  ;;  %v307_v55 = vadd.f32 %v2089_v3, %v268_v47  ;;  %v285_v0 = vmul.f32 %v2075_v1, %v246_v51  ;;  %v405_v4 = vrot.slane %v2133_v35, 1  ;;  %v516_v5 = vadd.s32 152, %v2077_v2  ;;  %v239_v51 = vld [vmem:[%s2084_s25 + $0x70] sm:$0xff] }
  0x1c   : > { %1138 = vrot.lane.b32.xlu0 %v2133_v35, %s2027_s28  ;;  %v2176_v60 = vmax.f32 %v323_v50, 0.0  ;;  %v500_v6 = vadd.s32 24, %v2077_v2  ;;  %v946_v8 = vsel %vm2172_vm1, %v404_v57, 0.0  ;;  %v2195_v9 = vsel %vm399_vm0, %v3113_v53, %v433_v54  ;;  %v234_v50 = vld [vmem:[%s2084_s25 + $0x48] sm:$0xff] }
  0x1d   : > { %v2180_v63 = vmax.f32 %v307_v55, 0.0  ;;  %3124 = vst [vmem:[#allocation2_spill] sm:$0xff] %v2195_v9  ;;  %v286_v10 = vmul.f32 %v2075_v1, %v247_v61  ;;  %v270_v11 = vmul.f32 %v2075_v1, %v231_v62  ;;  %v2200_v12 = vsel %vm399_vm0, %v433_v54, %v435_v36  ;;  %v248_v62 = vld [vmem:[%s2084_s25 + $0xb8] sm:$0xff] }
  0x1e   : > { %vm2202_vm2 = vcmp.lt.s32.totalorder %v652_v59, 15  ;;  %v439_v14 = vrot.slane %v2176_v60, 1  ;;  %v324_v16 = vadd.f32 %v2089_v3, %v285_v0  ;;  %v269_v17 = vmul.f32 %v2075_v1, %v230_v7 }
  0x1f   : > { %1291 = vrot.lane.b32.xlu1 %v2160_v49, %s2028_s8  ;;  %v407_v15 = vrot.slane %v2180_v63, 1  ;;  %v666_v20 = vand.u32 15, %v516_v5  ;;  %v554_v21 = vand.u32 15, %v500_v6  ;;  %v962_v22 = vsel %vm2202_vm2, %v2200_v12, 0.0 }
  0x20   : > { %1039 = vrot.lane.b32.xlu0 %v402_v52, %s2029_s9  ;;  %v406_v23 = vsel %vm399_vm0, %v403_v43, %v405_v4  ;;  %v325_v26 = vadd.f32 %v2089_v3, %v286_v10  ;;  %v309_v30 = vadd.f32 %v2089_v3, %v270_v11  ;;  %v2224_v33 = vsel %vm399_vm0, %v437_v37, %v439_v14  ;;  %v235_v11 = vld [vmem:[%s2084_s25 + $0x50] sm:$0xff] }
  0x21   : > { %v2229_v34 = vsel %vm399_vm0, %v405_v4, %v407_v15  ;;  %v288_v36 = vmul.f32 %v2075_v1, %v249_v18  ;;  %v272_v38 = vmul.f32 %v2075_v1, %v233_v19  ;;  %v2233_v39 = vmax.f32 %v324_v16, 0.0  ;;  %v252_v19 = vld [vmem:[%s2084_s25 + $0xd8] sm:$0xff] }
  0x22   : > { %v308_v40 = vadd.f32 %v2089_v3, %v269_v17  ;;  %v2239_v37 = vadd.s32 168, %v2077_v2  ;;  %v994_v45 = vsel %vm2202_vm2, %v2224_v33, 0.0  ;;  %v978_v46 = vsel %vm2172_vm1, %v2229_v34, 0.0 }
  0x23   : > { %1041 = vrot.lane.b32.xlu1 %v946_v8, %s2029_s9  ;;  %3127 = vst [vmem:[#allocation3_spill] sm:$0xff] %v2233_v39  ;;  %v2242_v43 = vadd.f32 %v2089_v3, %v288_v36  ;;  %v2245_v44 = vadd.f32 %v2089_v3, %v272_v38  ;;  %v2254_v47 = vadd.s32 40, %v2077_v2  ;;  %vm2258_vm3 = vcmp.lt.s32.totalorder %v666_v20, 15  ;;  %v236_v20 = vld [vmem:[%s2084_s25 + $0x58] sm:$0xff] }
  0x24   : > { %1071 = vrot.lane.b32.xlu0 %v2195_v9, %s2029_s9  ;;  %vm2262_vm4 = vcmp.lt.s32.totalorder %v554_v21, 15  ;;  %v2266_v54 = vmax.f32 %v325_v26, 0.0  ;;  %v2268_v55 = vmax.f32 %v309_v30, 0.0  ;;  %v2271_v57 = vmax.f32 %v308_v40, 0.0 }
  0x25   : > { %v441_v58 = vrot.slane %v2233_v39, 1  ;;  %v520_v59 = vadd.s32 184, %v2077_v2  ;;  %v680_v61 = vand.u32 15, %v2239_v37  ;;  %v504_v0 = vadd.s32 56, %v2077_v2 }
  0x26   : > { %3132 = vst [vmem:[#allocation4_spill] sm:$0xff] %v2271_v57  ;;  %v289_v4 = vmul.f32 %v2075_v1, %v250_v48  ;;  %v273_v5 = vmul.f32 %v2075_v1, %v234_v50  ;;  %v964_v6 = vsel %vm2258_vm3, %v2224_v33, 0.0  ;;  %v948_v7 = vsel %vm2262_vm4, %v2229_v34, 0.0 }
  0x27   : > { %1073 = vrot.lane.b32.xlu1 %v962_v22, %s2029_s9  ;;  %v290_v10 = vmul.f32 %v2075_v1, %v251_v56  ;;  %v3108_v13 = vrot.slane %v2266_v54, 1  ;;  %v3107_v16 = vrot.slane %v2268_v55, 1  ;;  %v2298_v21 = vsel %vm399_vm0, %v439_v14, %v441_v58 }
  0x28   : > { %1259 = vrot.lane.b32.xlu0 %v406_v23, %s2028_s8  ;;  %v328_v17 = vadd.f32 %v2089_v3, %v289_v4  ;;  %v312_v18 = vadd.f32 %v2089_v3, %v273_v5  ;;  %v409_v22 = vrot.slane %v2271_v57, 1  ;;  %v2302_v26 = vmul.f32 %v2075_v1, %v248_v62  ;;  %v253_v5 = vld [vmem:[%s2084_s25 + $0xe0] sm:$0xff] }
  0x29   : > { %v694_v30 = vand.u32 15, %v520_v59  ;;  %v329_v14 = vadd.f32 %v2089_v3, %v290_v10  ;;  %v274_v36 = vmul.f32 %v2075_v1, %v235_v11  ;;  %v522_v38 = vadd.s32 200, %v2077_v2  ;;  %v237_v10 = vld [vmem:[%s2084_s25 + $0x60] sm:$0xff] }
  0x2a   : > { %v2307_v33 = vmax.f32 %v328_v17, 0.0  ;;  %v2309_v34 = vmax.f32 %v312_v18, 0.0  ;;  %v506_v40 = vadd.s32 72, %v2077_v2  ;;  %vm2432_vm9 = vcmp.lt.s32.totalorder %v680_v61, 15 }
  0x2b   : > { %1293 = vrot.lane.b32.xlu1 %v994_v45, %s2028_s8  ;;  %v291_v45 = vmul.f32 %v2075_v1, %v252_v19  ;;  %v2327_v48 = vmax.f32 %v329_v14, 0.0  ;;  %v313_v50 = vadd.f32 %v2089_v3, %v274_v36  ;;  %v708_v56 = vand.u32 15, %v522_v38 }
  0x2c   : > { %1261 = vrot.lane.b32.xlu0 %v978_v46, %s2028_s8  ;;  %v2325_v46 = vsel %vm399_vm0, %v409_v22, %v3107_v16  ;;  %v596_v59 = vand.u32 15, %v506_v40  ;;  %v3106_v11 = vrot.slane %v2307_v33, 1  ;;  %vm2340_vm5 = vcmp.lt.s32.totalorder %v694_v30, 15 }
  0x2d   : > { %v330_v62 = vadd.f32 %v2089_v3, %v291_v45  ;;  %v3104_v17 = vrot.slane %v2327_v48, 1  ;;  %v2338_v18 = vmax.f32 %v313_v50, 0.0  ;;  %vm2345_vm6 = vcmp.lt.s32.totalorder %v708_v56, 15 }
  0x2e   : > { %vm2349_vm7 = vcmp.lt.s32.totalorder %v596_v59, 15  ;;  %v292_v30 = vmul.f32 %v2075_v1, %v253_v5  ;;  %v276_v36 = vmul.f32 %v2075_v1, %v237_v10  ;;  %v2394_v5 = vsel %vm399_vm0, %v407_v15, %v409_v22 }
  0x2f   : > { %1075 = vrot.lane.b32.xlu1 %v2160_v49, %s2029_s9  ;;  %v275_v49 = vmul.f32 %v2075_v1, %v236_v20  ;;  %v3105_v20 = vrot.slane %v2309_v34, 1  ;;  %v2369_v45 = vmax.f32 %v330_v62, 0.0  ;;  %v524_v15 = vadd.s32 216, %v2077_v2 }
  0x30   : > { %1043 = vrot.lane.b32.xlu0 %v406_v23, %s2029_s9  ;;  %v2320_v23 = vsel %vm399_vm0, %v441_v58, %v3108_v13  ;;  %v582_v58 = vand.u32 15, %v504_v0  ;;  %v2358_v0 = vsel %vm399_vm0, %v3106_v11, %v3104_v17  ;;  %v331_v59 = vadd.f32 %v2089_v3, %v292_v30 }
  0x31   : > { %v314_v4 = vadd.f32 %v2089_v3, %v275_v49  ;;  %v315_v62 = vadd.f32 %v2089_v3, %v276_v36  ;;  %v996_v10 = vsel %vm2258_vm3, %v2320_v23, 0.0  ;;  %v508_v22 = vadd.s32 88, %v2077_v2 }
  0x32   : > { %vm2377_vm8 = vcmp.lt.s32.totalorder %v582_v58, 15  ;;  %v2406_v36 = vmax.f32 %v331_v59, 0.0  ;;  %v980_v17 = vsel %vm2262_vm4, %v2325_v46, 0.0  ;;  %v3112_v40 = vrot.slane %v2369_v45, 1 }
  0x33   : > { %1077 = vrot.lane.b32.xlu1 %v964_v6, %s2029_s9  ;;  %v2371_v49 = vmax.f32 %v314_v4, 0.0  ;;  %v254_v4 = vld [vmem:[%s2084_s25 + $0xe8] sm:$0xff]  ;;  %v2408_v31 = vmax.f32 %v315_v62, 0.0  ;;  %v722_v62 = vand.u32 15, %v524_v15  ;;  %v610_v38 = vand.u32 15, %v508_v22  ;;  %v232_v22 = vld [vmem:[%s2084_s25 + $0x38] sm:$0xff] }
  0x34   : > { %1045 = vrot.lane.b32.xlu0 %v948_v7, %s2029_s9  ;;  %v3103_v7 = vrot.slane %v2338_v18, 1  ;;  %v293_v30 = vmul.f32 %v2075_v1, %v254_v4  ;;  %v3110_v59 = vrot.slane %v2406_v36, 1  ;;  %v277_v11 = vmul.f32 %v2075_v1, %v238_v32 }
  0x35   : > { %v3111_v58 = vrot.slane %v2371_v49, 1  ;;  %v3109_v52 = vrot.slane %v2408_v31, 1  ;;  %v278_v16 = vmul.f32 %v2075_v1, %v239_v51  ;;  %vm2450_vm10 = vcmp.lt.s32.totalorder %v722_v62, 15 }
  0x36   : > { %v2386_v56 = vsel %vm399_vm0, %v3105_v20, %v3103_v7  ;;  %v255_v7 = vld [vmem:[%s2084_s25 + $0xf0] sm:$0xff]  ;;  %v332_v20 = vadd.f32 %v2089_v3, %v293_v30  ;;  %v2441_v15 = vsel %vm399_vm0, %v3112_v40, %v3110_v59  ;;  %vm2454_vm11 = vcmp.lt.s32.totalorder %v610_v38, 15  ;;  %v240_v30 = vld [vmem:[%s2084_s25 + $0x78] sm:$0xff] }
  0x37   : > { %1172 = vrot.lane.b32.xlu1 %v2176_v60, %s2027_s28  ;;  %v294_v4 = vmul.f32 %v2075_v1, %v255_v7  ;;  %v2448_v32 = vsel %vm399_vm0, %v3111_v58, %v3109_v52  ;;  %v256_v7 = vld [vmem:[%s2084_s25 + $0xf8] sm:$0xff]  ;;  %v316_v51 = vadd.f32 %v2089_v3, %v277_v11  ;;  %v317_v58 = vadd.f32 %v2089_v3, %v278_v16 }
  0x38   : > { %1140 = vrot.lane.b32.xlu0 %v2180_v63, %s2027_s28  ;;  %v2477_v59 = vmax.f32 %v332_v20, 0.0  ;;  %v526_v62 = vadd.s32 232, %v2077_v2  ;;  %v510_v40 = vadd.s32 104, %v2077_v2  ;;  %v295_v38 = vmul.f32 %v2075_v1, %v256_v7 }
  0x39   : > { %v333_v52 = vadd.f32 %v2089_v3, %v294_v4  ;;  %v279_v53 = vmul.f32 %v2075_v1, %v240_v30  ;;  %v271_v8 = vmul.f32 %v2075_v1, %v232_v22  ;;  %v3161_v13 = vrot.slane %v2307_v33, 1 }
  0x3a   : > { %v736_v11 = vand.u32 15, %v526_v62  ;;  %v624_v4 = vand.u32 15, %v510_v40  ;;  %v334_v16 = vadd.f32 %v2089_v3, %v295_v38  ;;  %v457_v7 = vrot.slane %v2477_v59, 1 }
  0x3b   : > { %1174 = vrot.lane.b32.xlu1 %v2233_v39, %s2027_s28  ;;  %v2489_v20 = vmax.f32 %v333_v52, 0.0  ;;  %v2491_v39 = vmax.f32 %v317_v58, 0.0  ;;  %v318_v9 = vadd.f32 %v2089_v3, %v279_v53  ;;  %v3162_v22 = vrot.slane %v2309_v34, 1 }
  0x3c   : > { %1142 = vrot.lane.b32.xlu0 %v2271_v57, %s2027_s28  ;;  %v2487_v57 = vmax.f32 %v316_v51, 0.0  ;;  %vm2501_vm12 = vcmp.lt.s32.totalorder %v736_v11, 15  ;;  %vm2505_vm13 = vcmp.lt.s32.totalorder %v624_v4, 15  ;;  %v2509_v53 = vmax.f32 %v334_v16, 0.0 }
  0x3d   : > { %v3118_v30 = vrot.slane %v2489_v20, 1  ;;  %v3117_v52 = vrot.slane %v2491_v39, 1  ;;  %v966_v11 = vsel %vm2432_vm9, %v2320_v23, 0.0  ;;  %v3166_v19 = vsel %vm2349_vm7, %v2386_v56, 0.0 }
  0x3e   : > { %v3121_v1 = vrot.slane %v2487_v57, 1  ;;  %v3120_v16 = vrot.slane %v2509_v53, 1  ;;  %v3168_v50 = vrot.slane %v2327_v48, 1  ;;  %vm1352_vm2 = vcmask 31744  }
  0x3f   : > { %1295 = vrot.lane.b32.xlu1 %v2298_v21, %s2028_s8  ;;  %v2524_v51 = vsel %vm399_vm0, %v457_v7, %v3118_v30  ;;  %v512_v30 = vadd.s32 120, %v2077_v2  ;;  %v3173_v14 = vsel %vm2450_vm10, %v2441_v15, 0.0  ;;  %v3174_v6 = vsel %vm2454_vm11, %v2448_v32, 0.0 }
  0x40   : > { %1263 = vrot.lane.b32.xlu0 %v2394_v5, %s2028_s8  ;;  %v2565_v38 = vsel %vm399_vm0, %v3120_v16, 0.0  ;;  %vm1418_vm3 = vcmask 97280   ;;  %vm1385_vm4 = vcmask 64512   ;;  %v3182_v37 = vsel %vm2501_vm12, %v2524_v51, 0.0 }
  0x43   : > { %1297 = vrot.lane.b32.xlu1 %v996_v10, %s2028_s8  ;;  %v2511_v10 = vmax.f32 %v318_v9, 0.0  ;;  %v2531_v9 = vsel %vm399_vm0, %v3121_v1, %v3117_v52 }
  0x44   : > { %1265 = vrot.lane.b32.xlu0 %v980_v17, %s2028_s8  ;;  %v3151_v17 = vand.u32 15, %v2254_v47  ;;  %v528_v47 = vadd.s32 248, %v2077_v2  ;;  %v3154_v2 = vrot.slane %v2142_v41, 1  ;;  %v3183_v61 = vsel %vm2505_vm13, %v2531_v9, 0.0 }
  0x46   : > { %vm2515_vm14 = vcmp.lt.s32.totalorder %v3151_v17, 15  ;;  %v3119_v17 = vrot.slane %v2511_v10, 1  ;;  %v750_v52 = vand.u32 15, %v528_v47 }
  0x47   : > { %1079 = vrot.lane.b32.xlu1 %v2298_v21, %s2029_s9  ;;  %v950_v4 = vsel %vm2515_vm14, %v2325_v46, 0.0  ;;  %v326_v21 = vadd.f32 %v2089_v3, %v2302_v26  ;;  %v638_v26 = vand.u32 15, %v512_v30  ;;  %v2601_v30 = vmax.f32 %v2245_v44, 0.0 }
  0x48   : > { %1047 = vrot.lane.b32.xlu0 %v2394_v5, %s2029_s9  ;;  %v310_v5 = vadd.f32 %v2089_v3, %v271_v8  ;;  %v2572_v23 = vsel %vm399_vm0, %v3119_v17, %v3154_v2  ;;  %vm2580_vm15 = vcmp.lt.s32.totalorder %v750_v52, 15  ;;  %v2598_v52 = vmax.f32 %v2242_v43, 0.0 }
  0x49   : > { %v2589_v2 = vmax.f32 %v326_v21, 0.0  ;;  %vm2593_vm1 = vcmp.lt.s32.totalorder %v638_v26, 15  ;;  %v3159_v26 = vrot.slane %v2266_v54, 1  ;;  %v3190_v58 = vsel %vm2580_vm15, %v2565_v38, 0.0 }
  0x4a   : > { %v2591_v46 = vmax.f32 %v310_v5, 0.0  ;;  %v447_v44 = vrot.slane %v2598_v52, 1  ;;  %v415_v5 = vrot.slane %v2601_v30, 1  ;;  %v3191_v40 = vsel %vm2593_vm1, %v2572_v23, 0.0 }
  0x4b   : > { %1081 = vrot.lane.b32.xlu1 %v966_v11, %s2029_s9  ;;  %v445_v43 = vrot.slane %v2589_v2, 1  ;;  %v3160_v11 = vrot.slane %v2268_v55, 1 }
  0x4c   : > { %1049 = vrot.lane.b32.xlu0 %v950_v4, %s2029_s9  ;;  %v413_v21 = vrot.slane %v2591_v46, 1 }
  0x4d   : > { %v446_v4 = vsel %vm399_vm0, %v3159_v26, %v445_v43  ;;  %v448_v3 = vsel %vm399_vm0, %v445_v43, %v447_v44 }
  0x4e   : > { %v414_v47 = vsel %vm399_vm0, %v3160_v11, %v413_v21  ;;  %v416_v16 = vsel %vm399_vm0, %v413_v21, %v415_v5  ;;  %v998_v62 = vsel %vm2432_vm9, %v448_v3, 0.0  ;;  %v968_v11 = vsel %vm2340_vm5, %v448_v3, 0.0 }
  0x4f   : > { %1176 = vrot.lane.b32.xlu1 %v2266_v54, %s2027_s28  ;;  %v982_v1 = vsel %vm2515_vm14, %v416_v16, 0.0  ;;  %v952_v43 = vsel %vm2377_vm8, %v416_v16, 0.0  ;;  %v3163_v16 = vsel %vm2340_vm5, %v2358_v0, 0.0  ;;  %v3164_v3 = vsel %vm2377_vm8, %v2386_v56, 0.0 }
  0x50   : > { %1144 = vrot.lane.b32.xlu0 %v2268_v55, %s2027_s28  ;;  %v3169_v56 = vrot.slane %v2371_v49, 1  ;;  %v3170_v21 = vrot.slane %v2338_v18, 1  ;;  %vm1460_vm5 = vcmask 130048  }
  0x53   : > { %1178 = vrot.lane.b32.xlu1 %v2589_v2, %s2027_s28 }
  0x54   : > { %1146 = vrot.lane.b32.xlu0 %v2591_v46, %s2027_s28 }
  0x57   : > { %1299 = vrot.lane.b32.xlu1 %v446_v4, %s2028_s8 }
  0x58   : > { %1267 = vrot.lane.b32.xlu0 %v414_v47, %s2028_s8 }
  0x5b   : > { %1301 = vrot.lane.b32.xlu1 %v998_v62, %s2028_s8  ;;  %v418_v62 = vsel %vm399_vm0, %v415_v5, %v3162_v22 }
  0x5c   : > { %1269 = vrot.lane.b32.xlu0 %v982_v1, %s2028_s8  ;;  %v450_v1 = vsel %vm399_vm0, %v447_v44, %v3161_v13  ;;  %v422_v44 = vsel %vm399_vm0, %v3170_v21, %v3169_v56  ;;  %v3176_v56 = vmax.f32 %v2115_v25, 0.0 }
  0x5f   : > { %1083 = vrot.lane.b32.xlu1 %v446_v4, %s2029_s9 }
  0x60   : > { %1051 = vrot.lane.b32.xlu0 %v414_v47, %s2029_s9  ;;  %v3165_v47 = vsel %vm2345_vm6, %v2358_v0, 0.0  ;;  %v3167_v0 = vrot.slane %v2369_v45, 1 }
  0x62   : > { %v454_v4 = vsel %vm399_vm0, %v3168_v50, %v3167_v0 }
  0x63   : > { %1085 = vrot.lane.b32.xlu1 %v968_v11, %s2029_s9  ;;  %v3171_v11 = vsel %vm2345_vm6, %v2441_v15, 0.0 }
  0x64   : > { %1053 = vrot.lane.b32.xlu0 %v952_v43, %s2029_s9  ;;  %v3172_v43 = vsel %vm2349_vm7, %v2448_v32, 0.0 }
  0x67   : > { %1180 = vrot.lane.b32.xlu1 %v2598_v52, %s2027_s28 }
  0x68   : > { %1148 = vrot.lane.b32.xlu0 %v2601_v30, %s2027_s28 }
  0x6b   : > { %1182 = vrot.lane.b32.xlu1 %v2307_v33, %s2027_s28 }
  0x6c   : > { %1150 = vrot.lane.b32.xlu0 %v2309_v34, %s2027_s28 }
  0x6f   : > { %1303 = vrot.lane.b32.xlu1 %v450_v1, %s2028_s8 }
  0x70   : > { %1271 = vrot.lane.b32.xlu0 %v418_v62, %s2028_s8 }
  0x73   : > { %1305 = vrot.lane.b32.xlu1 %v3163_v16, %s2028_s8 }
  0x74   : > { %1273 = vrot.lane.b32.xlu0 %v3164_v3, %s2028_s8 }
  0x77   : > { %1087 = vrot.lane.b32.xlu1 %v450_v1, %s2029_s9 }
  0x78   : > { %1055 = vrot.lane.b32.xlu0 %v418_v62, %s2029_s9 }
  0x7b   : > { %1089 = vrot.lane.b32.xlu1 %v3165_v47, %s2029_s9  ;;  %v3175_v47 = vmax.f32 %v2112_v24, 0.0 }
  0x7c   : > { %1057 = vrot.lane.b32.xlu0 %v3166_v19, %s2029_s9 }
  0x7f   : > { %1184 = vrot.lane.b32.xlu1 %v2327_v48, %s2027_s28 }
  0x80   : > { %1152 = vrot.lane.b32.xlu0 %v2338_v18, %s2027_s28 }
  0x83   : > { %1186 = vrot.lane.b32.xlu1 %v2369_v45, %s2027_s28 }
  0x84   : > { %1154 = vrot.lane.b32.xlu0 %v2371_v49, %s2027_s28 }
  0x87   : > { %1307 = vrot.lane.b32.xlu1 %v454_v4, %s2028_s8 }
  0x88   : > { %1275 = vrot.lane.b32.xlu0 %v422_v44, %s2028_s8 }
  0x89   : > { %v1169_v5 = vpop.permute.xlu1 %1168 }
  0x8a   : > { %v1137_v26 = vpop.permute.xlu0 %1136 }
  0x8b   : > { %1309 = vrot.lane.b32.xlu1 %v3171_v11, %s2028_s8 }
  0x8c   : > { %1277 = vrot.lane.b32.xlu0 %v3172_v43, %s2028_s8  ;;  %v3179_v43 = vrot.slane %v2408_v31, 1 }
  0x8d   : > { %v1171_v13 = vpop.permute.xlu1 %1170 }
  0x8e   : > { %v1139_v1 = vpop.permute.xlu0 %1138 }
  0x8f   : > { %1091 = vrot.lane.b32.xlu1 %v454_v4, %s2029_s9 }
  0x90   : > { %1059 = vrot.lane.b32.xlu0 %v422_v44, %s2029_s9 }
  0x91   : > { %v1292_v22 = vpop.permute.xlu1 %1291 }
  0x92   : > { %v1040_v62 = vpop.permute.xlu0 %1039 }
  0x93   : > { %1093 = vrot.lane.b32.xlu1 %v3173_v14, %s2029_s9  ;;  %v1353_v19 = vsel %vm1352_vm2, %v3175_v47, %v1040_v62 }
  0x94   : > { %1061 = vrot.lane.b32.xlu0 %v3174_v6, %s2029_s9  ;;  %v1386_v4 = vsel %vm1385_vm4, %v1353_v19, %v1137_v26  ;;  %v3178_v26 = vrot.slane %v2487_v57, 1 }
  0x95   : > { %v1042_v16 = vpop.permute.xlu1 %1041 }
  0x96   : > { %v1072_v3 = vpop.permute.xlu0 %1071  ;;  %v1354_v21 = vsel %vm1352_vm2, %v3176_v56, %v1042_v16 }
  0x97   : > { %v1369_v0 = vsel %vm1352_vm2, %v2142_v41, %v1072_v3  ;;  %1188 = vrot.lane.b32.xlu1 %v2406_v36, %s2027_s28  ;;  %v1387_v6 = vsel %vm1385_vm4, %v1354_v21, %v1139_v1  ;;  %v3181_v1 = vsel %vm2454_vm11, %v2531_v9, 0.0 }
  0x98   : > { %1156 = vrot.lane.b32.xlu0 %v2408_v31, %s2027_s28  ;;  %v1402_v15 = vsel %vm1385_vm4, %v1369_v0, %v1169_v5  ;;  %v3177_v5 = vrot.slane %v2406_v36, 1 }
  0x99   : > { %v1435_v32 = vsel %vm1418_vm3, %v1402_v15, %v1292_v22  ;;  %v1074_v50 = vpop.permute.xlu1 %1073  ;;  %v426_v22 = vsel %vm399_vm0, %v3179_v43, %v3178_v26 }
  0x9a   : > { %1979 = vmatprep.mubr.msk.f32.mxu1 %vm1460_vm5, %v1435_v32  ;;  %v1260_v24 = vpop.permute.xlu0 %1259  ;;  %v1370_v44 = vsel %vm1352_vm2, %v2144_v42, %v1074_v50  ;;  %v458_v25 = vsel %vm399_vm0, %v3177_v5, %v457_v7 }
  0x9b   : > { %v1419_v11 = vsel %vm1418_vm3, %v1386_v4, %v1260_v24  ;;  %1190 = vrot.lane.b32.xlu1 %v2477_v59, %s2027_s28  ;;  %v1403_v62 = vsel %vm1385_vm4, %v1370_v44, %v1171_v13  ;;  %v3180_v13 = vsel %vm2450_vm10, %v2524_v51, 0.0 }
  0x9c   : > { %1158 = vrot.lane.b32.xlu0 %v2487_v57, %s2027_s28  ;;  %1955 = vmatprep.mubr.msk.f32.mxu0 %vm1460_vm5, %v1419_v11 }
  0x9d   : > { %v1294_v14 = vpop.permute.xlu1 %1293 }
  0x9e   : > { %v1262_v16 = vpop.permute.xlu0 %1261  ;;  %v1436_v3 = vsel %vm1418_vm3, %v1403_v62, %v1294_v14  ;;  %v3186_v62 = vrot.slane %v2511_v10, 1  ;;  %v3187_v14 = vrot.slane %v2491_v39, 1 }
  0x9f   : > { %v1420_v47 = vsel %vm1418_vm3, %v1387_v6, %v1262_v16  ;;  %1311 = vrot.lane.b32.xlu1 %v458_v25, %s2028_s8  ;;  %1980 = vmatmul.mubr.msk.f32.vlgmr.msra.gmra.mxu1 %vm1460_vm5, %v1436_v3 }
  0xa0   : > { %1279 = vrot.lane.b32.xlu0 %v426_v22, %s2028_s8  ;;  %1956 = vmatmul.mubr.msk.f32.vlgmr.msra.gmra.mxu0 %vm1460_vm5, %v1420_v47  ;;  %v430_v6 = vsel %vm399_vm0, %v3187_v14, %v3186_v62 }
  0xa1   : > { %v1076_v7 = vpop.permute.xlu1 %1075 }
  0xa2   : > { %v1044_v19 = vpop.permute.xlu0 %1043  ;;  %v1371_v56 = vsel %vm1352_vm2, %v2118_v27, %v1076_v7  ;;  %v3184_v27 = vrot.slane %v2509_v53, 1 }
  0xa3   : > { %1313 = vrot.lane.b32.xlu1 %v3180_v13, %s2028_s8  ;;  %v1355_v51 = vsel %vm1352_vm2, %v2120_v28, %v1044_v19  ;;  %v3185_v28 = vrot.slane %v2489_v20, 1 }
  0xa4   : > { %1281 = vrot.lane.b32.xlu0 %v3181_v1, %s2028_s8  ;;  %v3188_v1 = vsel %vm2501_vm12, %v2565_v38, 0.0 }
  0xa5   : > { %v1078_v0 = vpop.permute.xlu1 %1077  ;;  %v462_v26 = vsel %vm399_vm0, %v3185_v28, %v3184_v27 }
  0xa6   : > { %v1046_v15 = vpop.permute.xlu0 %1045  ;;  %v1372_v43 = vsel %vm1352_vm2, %v2122_v29, %v1078_v0  ;;  %v3189_v0 = vsel %vm2505_vm13, %v2572_v23, 0.0 }
  0xa7   : > { %1095 = vrot.lane.b32.xlu1 %v458_v25, %s2029_s9 }
  0xa8   : > { %1063 = vrot.lane.b32.xlu0 %v426_v22, %s2029_s9  ;;  %v1356_v22 = vsel %vm1352_vm2, %v2133_v35, %v1046_v15 }
  0xa9   : > { %v1173_v32 = vpop.permute.xlu1 %1172 }
  0xaa   : > { %v1141_v50 = vpop.permute.xlu0 %1140  ;;  %v1404_v21 = vsel %vm1385_vm4, %v1371_v56, %v1173_v32 }
  0xab   : > { %1097 = vrot.lane.b32.xlu1 %v3182_v37, %s2029_s9  ;;  %v1388_v44 = vsel %vm1385_vm4, %v1355_v51, %v1141_v50 }
  0xac   : > { %1065 = vrot.lane.b32.xlu0 %v3183_v61, %s2029_s9 }
  0xad   : > { %v1175_v24 = vpop.permute.xlu1 %1174 }
  0xae   : > { %v1143_v4 = vpop.permute.xlu0 %1142  ;;  %v1405_v16 = vsel %vm1385_vm4, %v1372_v43, %v1175_v24 }
  0xaf   : > { %1192 = vrot.lane.b32.xlu1 %v2489_v20, %s2027_s28  ;;  %v1389_v3 = vsel %vm1385_vm4, %v1356_v22, %v1143_v4  ;;  %v2030_v4 = vmov 0.0   ;;  %v3195_v22 = vsel %vm2593_vm1, %v2200_v12, 0.0 }
  0xb0   : > { %1160 = vrot.lane.b32.xlu0 %v2491_v39, %s2027_s28 }
  0xb1   : > { %v1296_v9 = vpop.permute.xlu1 %1295 }
  0xb2   : > { %v1264_v11 = vpop.permute.xlu0 %1263  ;;  %v1437_v5 = vsel %vm1418_vm3, %v1404_v21, %v1296_v9 }
  0xb3   : > { %v1421_v25 = vsel %vm1418_vm3, %v1388_v44, %v1264_v11  ;;  %1194 = vrot.lane.b32.xlu1 %v2509_v53, %s2027_s28  ;;  %1982 = vmatprep.mubr.msk.f32.mxu1 %vm1460_vm5, %v1437_v5  ;;  %v3192_v11 = vld [vmem:[#allocation2_spill] sm:$0xff] }
  0xb4   : > { %1162 = vrot.lane.b32.xlu0 %v2511_v10, %s2027_s28  ;;  %1958 = vmatprep.mubr.msk.f32.mxu0 %vm1460_vm5, %v1421_v25 }
  0xb5   : > { %v1298_v47 = vpop.permute.xlu1 %1297 }
  0xb6   : > { %v1266_v7 = vpop.permute.xlu0 %1265  ;;  %v1438_v29 = vsel %vm1418_vm3, %v1405_v16, %v1298_v47 }
  0xb7   : > { %v1422_v35 = vsel %vm1418_vm3, %v1389_v3, %v1266_v7  ;;  %1315 = vrot.lane.b32.xlu1 %v462_v26, %s2028_s8  ;;  %1983 = vmatmul.mubr.msk.f32.gmra.mxu1 %vm1460_vm5, %v1438_v29 }
  0xb8   : > { %1283 = vrot.lane.b32.xlu0 %v430_v6, %s2028_s8  ;;  %1959 = vmatmul.mubr.msk.f32.gmra.mxu0 %vm1460_vm5, %v1422_v35 }
  0xb9   : > { %v1080_v19 = vpop.permute.xlu1 %1079 }
  0xba   : > { %v1048_v13 = vpop.permute.xlu0 %1047  ;;  %v1373_v8 = vsel %vm1352_vm2, %v2176_v60, %v1080_v19 }
  0xbb   : > { %1317 = vrot.lane.b32.xlu1 %v3188_v1, %s2028_s8  ;;  %v1357_v38 = vsel %vm1352_vm2, %v2180_v63, %v1048_v13  ;;  %v3194_v63 = vld [vmem:[#allocation4_spill] sm:$0xff] }
  0xbc   : > { %1285 = vrot.lane.b32.xlu0 %v3189_v0, %s2028_s8 }
  0xbd   : > { %v1082_v15 = vpop.permute.xlu1 %1081 }
  0xbe   : > { %v1050_v32 = vpop.permute.xlu0 %1049 }
  0xbf   : > { %1099 = vrot.lane.b32.xlu1 %v462_v26, %s2029_s9  ;;  %v1358_v5 = vsel %vm1352_vm2, %v3194_v63, %v1050_v32 }
  0xc0   : > { %1067 = vrot.lane.b32.xlu0 %v430_v6, %s2029_s9 }
  0xc1   : > { %v1177_v50 = vpop.permute.xlu1 %1176 }
  0xc2   : > { %v1145_v37 = vpop.permute.xlu0 %1144  ;;  %v1406_v56 = vsel %vm1385_vm4, %v1373_v8, %v1177_v50 }
  0xc3   : > { %1101 = vrot.lane.b32.xlu1 %v3190_v58, %s2029_s9  ;;  %v1390_v51 = vsel %vm1385_vm4, %v1357_v38, %v1145_v37 }
  0xc4   : > { %1069 = vrot.lane.b32.xlu0 %v3191_v40, %s2029_s9 }
  0xc5   : > { %v1179_v61 = vpop.permute.xlu1 %1178 }
  0xc6   : > { %v1147_v24 = vpop.permute.xlu0 %1146 }
  0xc7   : > { %1196 = vrot.lane.b32.xlu1 %v2030_v4, %s2027_s28  ;;  %v1391_v27 = vsel %vm1385_vm4, %v1358_v5, %v1147_v24 }
  0xc8   : > { %1164 = vrot.lane.b32.xlu0 %v2142_v41, %s2027_s28  ;;  %v3193_v41 = vld [vmem:[#allocation3_spill] sm:$0xff] }
  0xc9   : > { %v1300_v23 = vpop.permute.xlu1 %1299  ;;  %v1374_v60 = vsel %vm1352_vm2, %v3193_v41, %v1082_v15 }
  0xca   : > { %v1268_v21 = vpop.permute.xlu0 %1267  ;;  %v1439_v44 = vsel %vm1418_vm3, %v1406_v56, %v1300_v23  ;;  %v1407_v25 = vsel %vm1385_vm4, %v1374_v60, %v1179_v61 }
  0xcb   : > { %v1423_v9 = vsel %vm1418_vm3, %v1390_v51, %v1268_v21  ;;  %1287 = vrot.lane.b32.xlu1 %v3192_v11, %s2028_s8  ;;  %1985 = vmatprep.mubr.msk.f32.mxu1 %vm1460_vm5, %v1439_v44 }
  0xcc   : > { %1166 = vrot.lane.b32.xlu0 %v2144_v42, %s2027_s28  ;;  %1961 = vmatprep.mubr.msk.f32.mxu0 %vm1460_vm5, %v1423_v9 }
  0xcd   : > { %v1302_v28 = vpop.permute.xlu1 %1301 }
  0xce   : > { %v1270_v26 = vpop.permute.xlu0 %1269  ;;  %v1440_v43 = vsel %vm1418_vm3, %v1407_v25, %v1302_v28 }
  0xcf   : > { %v1424_v42 = vsel %vm1418_vm3, %v1391_v27, %v1270_v26  ;;  %1289 = vrot.lane.b32.xlu1 %v3195_v22, %s2028_s8  ;;  %1986 = vmatmul.mubr.msk.f32.gmra.mxu1 %vm1460_vm5, %v1440_v43 }
  0xd0   : > { %1319 = vrot.lane.b32.xlu0 %v2030_v4, %s2028_s8  ;;  %1962 = vmatmul.mubr.msk.f32.gmra.mxu0 %vm1460_vm5, %v1424_v42 }
  0xd1   : > { %v1084_v62 = vpop.permute.xlu1 %1083 }
  0xd2   : > { %v1052_v14 = vpop.permute.xlu0 %1051  ;;  %v1375_v17 = vsel %vm1352_vm2, %v2266_v54, %v1084_v62 }
  0xd3   : > { %v1359_v12 = vsel %vm1352_vm2, %v2268_v55, %v1052_v14 }
  0xd5   : > { %v1086_v6 = vpop.permute.xlu1 %1085 }
  0xd6   : > { %v1054_v16 = vpop.permute.xlu0 %1053  ;;  %v1376_v54 = vsel %vm1352_vm2, %v2589_v2, %v1086_v6 }
  0xd7   : > { %v1360_v55 = vsel %vm1352_vm2, %v2591_v46, %v1054_v16 }
  0xd9   : > { %v1181_v3 = vpop.permute.xlu1 %1180 }
  0xda   : > { %v1149_v47 = vpop.permute.xlu0 %1148  ;;  %v1408_v35 = vsel %vm1385_vm4, %v1375_v17, %v1181_v3 }
  0xdb   : > { %v1392_v19 = vsel %vm1385_vm4, %v1359_v12, %v1149_v47 }
  0xdd   : > { %v1183_v7 = vpop.permute.xlu1 %1182 }
  0xde   : > { %v1151_v29 = vpop.permute.xlu0 %1150  ;;  %v1409_v32 = vsel %vm1385_vm4, %v1376_v54, %v1183_v7 }
  0xdf   : > { %v1393_v50 = vsel %vm1385_vm4, %v1360_v55, %v1151_v29 }
  0xe1   : > { %v1304_v13 = vpop.permute.xlu1 %1303 }
  0xe2   : > { %v1272_v1 = vpop.permute.xlu0 %1271  ;;  %v1441_v0 = vsel %vm1418_vm3, %v1408_v35, %v1304_v13 }
  0xe3   : > { %v1425_v15 = vsel %vm1418_vm3, %v1392_v19, %v1272_v1  ;;  %1988 = vmatprep.mubr.msk.f32.mxu1 %vm1460_vm5, %v1441_v0 }
  0xe4   : > { %1964 = vmatprep.mubr.msk.f32.mxu0 %vm1460_vm5, %v1425_v15 }
  0xe5   : > { %v1306_v37 = vpop.permute.xlu1 %1305 }
  0xe6   : > { %v1274_v58 = vpop.permute.xlu0 %1273  ;;  %v1442_v40 = vsel %vm1418_vm3, %v1409_v32, %v1306_v37 }
  0xe7   : > { %v1426_v61 = vsel %vm1418_vm3, %v1393_v50, %v1274_v58  ;;  %1989 = vmatmul.mubr.msk.f32.gmra.mxu1 %vm1460_vm5, %v1442_v40 }
  0xe8   : > { %1965 = vmatmul.mubr.msk.f32.gmra.mxu0 %vm1460_vm5, %v1426_v61 }
  0xe9   : > { %v1088_v24 = vpop.permute.xlu1 %1087 }
  0xea   : > { %v1056_v4 = vpop.permute.xlu0 %1055  ;;  %v1377_v23 = vsel %vm1352_vm2, %v2598_v52, %v1088_v24 }
  0xeb   : > { %v1361_v21 = vsel %vm1352_vm2, %v2601_v30, %v1056_v4 }
  0xed   : > { %v1090_v2 = vpop.permute.xlu1 %1089 }
  0xee   : > { %v1058_v8 = vpop.permute.xlu0 %1057  ;;  %v1378_v52 = vsel %vm1352_vm2, %v2307_v33, %v1090_v2 }
  0xef   : > { %v1362_v30 = vsel %vm1352_vm2, %v2309_v34, %v1058_v8 }
  0xf1   : > { %v1185_v38 = vpop.permute.xlu1 %1184 }
  0xf2   : > { %v1153_v46 = vpop.permute.xlu0 %1152  ;;  %v1410_v44 = vsel %vm1385_vm4, %v1377_v23, %v1185_v38 }
  0xf3   : > { %v1394_v9 = vsel %vm1385_vm4, %v1361_v21, %v1153_v46 }
  0xf5   : > { %v1187_v56 = vpop.permute.xlu1 %1186 }
  0xf6   : > { %v1155_v51 = vpop.permute.xlu0 %1154  ;;  %v1411_v5 = vsel %vm1385_vm4, %v1378_v52, %v1187_v56 }
  0xf7   : > { %v1395_v25 = vsel %vm1385_vm4, %v1362_v30, %v1155_v51 }
  0xf9   : > { %v1308_v11 = vpop.permute.xlu1 %1307 }
  0xfa   : > { %v1276_v41 = vpop.permute.xlu0 %1275  ;;  %v1443_v60 = vsel %vm1418_vm3, %v1410_v44, %v1308_v11 }
  0xfb   : > { %v1427_v63 = vsel %vm1418_vm3, %v1394_v9, %v1276_v41  ;;  %1991 = vmatprep.mubr.msk.f32.mxu1 %vm1460_vm5, %v1443_v60 }
  0xfc   : > { %1967 = vmatprep.mubr.msk.f32.mxu0 %vm1460_vm5, %v1427_v63 }
  0xfd   : > { %v1310_v27 = vpop.permute.xlu1 %1309 }
  0xfe   : > { %v1278_v28 = vpop.permute.xlu0 %1277  ;;  %v1444_v26 = vsel %vm1418_vm3, %v1411_v5, %v1310_v27 }
  0xff   : > { %v1428_v43 = vsel %vm1418_vm3, %v1395_v25, %v1278_v28  ;;  %1992 = vmatmul.mubr.msk.f32.gmra.mxu1 %vm1460_vm5, %v1444_v26 }
 0x100   : > { %1968 = vmatmul.mubr.msk.f32.gmra.mxu0 %vm1460_vm5, %v1428_v43 }
 0x101   : > { %v1092_v42 = vpop.permute.xlu1 %1091 }
 0x102   : > { %v1060_v22 = vpop.permute.xlu0 %1059  ;;  %v1379_v3 = vsel %vm1352_vm2, %v2327_v48, %v1092_v42 }
 0x103   : > { %v1363_v47 = vsel %vm1352_vm2, %v2338_v18, %v1060_v22 }
 0x105   : > { %v1094_v33 = vpop.permute.xlu1 %1093 }
 0x106   : > { %v1062_v62 = vpop.permute.xlu0 %1061  ;;  %v1380_v48 = vsel %vm1352_vm2, %v2369_v45, %v1094_v33 }
 0x107   : > { %v1364_v18 = vsel %vm1352_vm2, %v2371_v49, %v1062_v62 }
 0x109   : > { %v1189_v14 = vpop.permute.xlu1 %1188 }
 0x10a   : > { %v1157_v34 = vpop.permute.xlu0 %1156  ;;  %v1412_v7 = vsel %vm1385_vm4, %v1379_v3, %v1189_v14 }
 0x10b   : > { %v1396_v29 = vsel %vm1385_vm4, %v1363_v47, %v1157_v34 }
 0x10d   : > { %v1191_v6 = vpop.permute.xlu1 %1190 }
 0x10e   : > { %v1159_v16 = vpop.permute.xlu0 %1158  ;;  %v1413_v13 = vsel %vm1385_vm4, %v1380_v48, %v1191_v6 }
 0x10f   : > { %v1397_v1 = vsel %vm1385_vm4, %v1364_v18, %v1159_v16 }
 0x111   : > { %v1312_v17 = vpop.permute.xlu1 %1311 }
 0x112   : > { %v1280_v12 = vpop.permute.xlu0 %1279  ;;  %v1445_v35 = vsel %vm1418_vm3, %v1412_v7, %v1312_v17 }
 0x113   : > { %v1429_v19 = vsel %vm1418_vm3, %v1396_v29, %v1280_v12  ;;  %1994 = vmatprep.mubr.msk.f32.mxu1 %vm1460_vm5, %v1445_v35 }
 0x114   : > { %1970 = vmatprep.mubr.msk.f32.mxu0 %vm1460_vm5, %v1429_v19 }
 0x115   : > { %v1314_v0 = vpop.permute.xlu1 %1313 }
 0x116   : > { %v1282_v15 = vpop.permute.xlu0 %1281  ;;  %v1446_v54 = vsel %vm1418_vm3, %v1413_v13, %v1314_v0 }
 0x117   : > { %v1430_v55 = vsel %vm1418_vm3, %v1397_v1, %v1282_v15  ;;  %1995 = vmatmul.mubr.msk.f32.gmra.mxu1 %vm1460_vm5, %v1446_v54 }
 0x118   : > { %1971 = vmatmul.mubr.msk.f32.gmra.mxu0 %vm1460_vm5, %v1430_v55 }
 0x119   : > { %v1096_v32 = vpop.permute.xlu1 %1095 }
 0x11a   : > { %v1064_v50 = vpop.permute.xlu0 %1063  ;;  %v1381_v24 = vsel %vm1352_vm2, %v2406_v36, %v1096_v32 }
 0x11b   : > { %v1365_v4 = vsel %vm1352_vm2, %v2408_v31, %v1064_v50 }
 0x11d   : > { %v1098_v45 = vpop.permute.xlu1 %1097 }
 0x11e   : > { %v1066_v37 = vpop.permute.xlu0 %1065  ;;  %v1382_v36 = vsel %vm1352_vm2, %v2477_v59, %v1098_v45 }
 0x11f   : > { %v1366_v31 = vsel %vm1352_vm2, %v2487_v57, %v1066_v37 }
 0x121   : > { %v1193_v58 = vpop.permute.xlu1 %1192 }
 0x122   : > { %v1161_v49 = vpop.permute.xlu0 %1160  ;;  %v1414_v2 = vsel %vm1385_vm4, %v1381_v24, %v1193_v58 }
 0x123   : > { %v1398_v8 = vsel %vm1385_vm4, %v1365_v4, %v1161_v49 }
 0x125   : > { %v1195_v40 = vpop.permute.xlu1 %1194 }
 0x126   : > { %v1163_v61 = vpop.permute.xlu0 %1162  ;;  %v1415_v23 = vsel %vm1385_vm4, %v1382_v36, %v1195_v40 }
 0x127   : > { %v1399_v21 = vsel %vm1385_vm4, %v1366_v31, %v1163_v61 }
 0x129   : > { %v1316_v38 = vpop.permute.xlu1 %1315 }
 0x12a   : > { %v1284_v46 = vpop.permute.xlu0 %1283  ;;  %v1447_v56 = vsel %vm1418_vm3, %v1414_v2, %v1316_v38 }
 0x12b   : > { %v1431_v51 = vsel %vm1418_vm3, %v1398_v8, %v1284_v46  ;;  %1997 = vmatprep.mubr.msk.f32.mxu1 %vm1460_vm5, %v1447_v56 }
 0x12c   : > { %1973 = vmatprep.mubr.msk.f32.mxu0 %vm1460_vm5, %v1431_v51 }
 0x12d   : > { %v1318_v44 = vpop.permute.xlu1 %1317 }
 0x12e   : > { %v1286_v9 = vpop.permute.xlu0 %1285  ;;  %v1448_v11 = vsel %vm1418_vm3, %v1415_v23, %v1318_v44 }
 0x12f   : > { %v1432_v41 = vsel %vm1418_vm3, %v1399_v21, %v1286_v9  ;;  %1998 = vmatmul.mubr.msk.f32.gmra.mxu1 %vm1460_vm5, %v1448_v11 }
 0x130   : > { %1974 = vmatmul.mubr.msk.f32.gmra.mxu0 %vm1460_vm5, %v1432_v41 }
 0x131   : > { %v1100_v60 = vpop.permute.xlu1 %1099 }
 0x132   : > { %v1068_v63 = vpop.permute.xlu0 %1067  ;;  %v1383_v43 = vsel %vm1352_vm2, %v2489_v20, %v1100_v60 }
 0x133   : > { %v1367_v5 = vsel %vm1352_vm2, %v2491_v39, %v1068_v63 }
 0x135   : > { %v1102_v59 = vpop.permute.xlu1 %1101 }
 0x136   : > { %v1070_v52 = vpop.permute.xlu0 %1069  ;;  %v1384_v42 = vsel %vm1352_vm2, %v2509_v53, %v1102_v59  ;;  %v2987_v53 = vld [vmem:[%s3099_s4] ss:$0 sm:$0xff] }
 0x137   : > { %v1368_v22 = vsel %vm1352_vm2, %v2511_v10, %v1070_v52 }
 0x139   : > { %v1197_v30 = vpop.permute.xlu1 %1196 }
 0x13a   : > { %v1165_v57 = vpop.permute.xlu0 %1164  ;;  %v1416_v39 = vsel %vm1385_vm4, %v1383_v43, %v1197_v30  ;;  %v1417_v33 = vsel %vm1385_vm4, %v1384_v42, %v1197_v30 }
 0x13b   : > { %v1400_v25 = vsel %vm1385_vm4, %v1367_v5, %v1165_v57 }
 0x13d   : > { %v1288_v27 = vpop.permute.xlu1 %1287 }
 0x13e   : > { %v1167_v28 = vpop.permute.xlu0 %1166  ;;  %v1433_v26 = vsel %vm1418_vm3, %v1400_v25, %v1288_v27 }
 0x13f   : > { %1976 = vmatprep.mubr.msk.f32.mxu0 %vm1460_vm5, %v1433_v26  ;;  %v1401_v62 = vsel %vm1385_vm4, %v1368_v22, %v1167_v28 }
 0x141   : > { %v1290_v14 = vpop.permute.xlu1 %1289 }
 0x142   : > { %v1320_v34 = vpop.permute.xlu0 %1319  ;;  %v1434_v6 = vsel %vm1418_vm3, %v1401_v62, %v1290_v14 }
 0x143   : > { %v1449_v16 = vsel %vm1418_vm3, %v1416_v39, %v1320_v34  ;;  %v1450_v20 = vsel %vm1418_vm3, %v1417_v33, %v1320_v34  ;;  %1977 = vmatmul.mubr.msk.f32.gmra.mxu0 %vm1460_vm5, %v1434_v6 }
 0x144   : > { %2000 = vmatprep.mubr.msk.f32.mxu1 %vm1460_vm5, %v1449_v16 }
 0x145   : > { %2001 = vmatmul.mubr.msk.f32.gmra.mxu1 %vm1460_vm5, %v1450_v20 }
 0x15f   : > { %v1981_v3 = vpop.f32.mrf.mxu1 }
 0x160   : > { %v1957_v10 = vpop.f32.mrf.mxu0  ;;  %v1709_v7 = vadd.f32 %v1981_v3, %v2987_v53 }
 0x161   : > { %v1629_v47 = vadd.f32 %v1957_v10, %v2987_v53  ;;  %v1703_v17 = vpop.f32.mrf.mxu1 }
 0x162   : > { %v1623_v29 = vpop.f32.mrf.mxu0  ;;  %1799 = vst.msk [vmem:[%s2994_s14 + $0x88] sm:$0xff] %vm1385_vm4, %v1709_v7  ;;  %v1704_v35 = vadd.f32 %v2987_v53, %v1703_v17 }
 0x163   : > { %1783 = vst.msk [vmem:[%s2994_s14 + $0x8] sm:$0xff] %vm1385_vm4, %v1629_v47  ;;  %v1624_v12 = vadd.f32 %v2987_v53, %v1623_v29 }
 0x164   : > { %1798 = vst.msk [vmem:[%s2994_s14 + $0x80] sm:$0xff] %vm1385_vm4, %v1704_v35 }
 0x165   : > { %1782 = vst.msk [vmem:[%s2994_s14] sm:$0xff] %vm1385_vm4, %v1624_v12 }
 0x177   : > { %v1984_v48 = vpop.f32.mrf.mxu1 }
 0x178   : > { %v1960_v19 = vpop.f32.mrf.mxu0  ;;  %v1719_v13 = vadd.f32 %v1984_v48, %v2987_v53 }
 0x179   : > { %v1639_v18 = vadd.f32 %v1960_v19, %v2987_v53  ;;  %v1713_v0 = vpop.f32.mrf.mxu1 }
 0x17a   : > { %v1633_v1 = vpop.f32.mrf.mxu0  ;;  %1801 = vst.msk [vmem:[%s2994_s14 + $0x98] sm:$0xff] %vm1385_vm4, %v1719_v13  ;;  %v1714_v54 = vadd.f32 %v2987_v53, %v1713_v0 }
 0x17b   : > { %1785 = vst.msk [vmem:[%s2994_s14 + $0x18] sm:$0xff] %vm1385_vm4, %v1639_v18  ;;  %v1634_v15 = vadd.f32 %v2987_v53, %v1633_v1 }
 0x17c   : > { %1800 = vst.msk [vmem:[%s2994_s14 + $0x90] sm:$0xff] %vm1385_vm4, %v1714_v54 }
 0x17d   : > { %1784 = vst.msk [vmem:[%s2994_s14 + $0x10] sm:$0xff] %vm1385_vm4, %v1634_v15 }
 0x18f   : > { %v1987_v32 = vpop.f32.mrf.mxu1 }
 0x190   : > { %v1963_v55 = vpop.f32.mrf.mxu0  ;;  %v1729_v45 = vadd.f32 %v1987_v32, %v2987_v53 }
 0x191   : > { %v1649_v50 = vadd.f32 %v1963_v55, %v2987_v53  ;;  %v1723_v58 = vpop.f32.mrf.mxu1 }
 0x192   : > { %v1643_v37 = vpop.f32.mrf.mxu0  ;;  %1803 = vst.msk [vmem:[%s2994_s14 + $0xa8] sm:$0xff] %vm1385_vm4, %v1729_v45  ;;  %v1724_v40 = vadd.f32 %v2987_v53, %v1723_v58 }
 0x193   : > { %1787 = vst.msk [vmem:[%s2994_s14 + $0x28] sm:$0xff] %vm1385_vm4, %v1649_v50  ;;  %v1644_v49 = vadd.f32 %v2987_v53, %v1643_v37 }
 0x194   : > { %1802 = vst.msk [vmem:[%s2994_s14 + $0xa0] sm:$0xff] %vm1385_vm4, %v1724_v40 }
 0x195   : > { %1786 = vst.msk [vmem:[%s2994_s14 + $0x20] sm:$0xff] %vm1385_vm4, %v1644_v49 }
 0x1a7   : > { %v1990_v24 = vpop.f32.mrf.mxu1 }
 0x1a8   : > { %v1966_v61 = vpop.f32.mrf.mxu0  ;;  %v1739_v2 = vadd.f32 %v1990_v24, %v2987_v53 }
 0x1a9   : > { %v1659_v4 = vadd.f32 %v1966_v61, %v2987_v53  ;;  %v1733_v38 = vpop.f32.mrf.mxu1 }
 0x1aa   : > { %v1653_v8 = vpop.f32.mrf.mxu0  ;;  %1805 = vst.msk [vmem:[%s2994_s14 + $0xb8] sm:$0xff] %vm1385_vm4, %v1739_v2  ;;  %v1734_v56 = vadd.f32 %v2987_v53, %v1733_v38 }
 0x1ab   : > { %1789 = vst.msk [vmem:[%s2994_s14 + $0x38] sm:$0xff] %vm1385_vm4, %v1659_v4  ;;  %v1654_v46 = vadd.f32 %v2987_v53, %v1653_v8 }
 0x1ac   : > { %1804 = vst.msk [vmem:[%s2994_s14 + $0xb0] sm:$0xff] %vm1385_vm4, %v1734_v56 }
 0x1ad   : > { %1788 = vst.msk [vmem:[%s2994_s14 + $0x30] sm:$0xff] %vm1385_vm4, %v1654_v46 }
 0x1bf   : > { %v1993_v36 = vpop.f32.mrf.mxu1 }
 0x1c0   : > { %v1969_v51 = vpop.f32.mrf.mxu0  ;;  %v1749_v23 = vadd.f32 %v1993_v36, %v2987_v53 }
 0x1c1   : > { %v1669_v31 = vadd.f32 %v1969_v51, %v2987_v53  ;;  %v1743_v44 = vpop.f32.mrf.mxu1 }
 0x1c2   : > { %v1663_v21 = vpop.f32.mrf.mxu0  ;;  %1807 = vst.msk [vmem:[%s2994_s14 + $0xc8] sm:$0xff] %vm1385_vm4, %v1749_v23  ;;  %v1744_v11 = vadd.f32 %v2987_v53, %v1743_v44 }
 0x1c3   : > { %1791 = vst.msk [vmem:[%s2994_s14 + $0x48] sm:$0xff] %vm1385_vm4, %v1669_v31  ;;  %v1664_v9 = vadd.f32 %v2987_v53, %v1663_v21 }
 0x1c4   : > { %1806 = vst.msk [vmem:[%s2994_s14 + $0xc0] sm:$0xff] %vm1385_vm4, %v1744_v11 }
 0x1c5   : > { %1790 = vst.msk [vmem:[%s2994_s14 + $0x40] sm:$0xff] %vm1385_vm4, %v1664_v9 }
 0x1d7   : > { %v1996_v60 = vpop.f32.mrf.mxu1 }
 0x1d8   : > { %v1972_v41 = vpop.f32.mrf.mxu0  ;;  %v1759_v59 = vadd.f32 %v1996_v60, %v2987_v53 }
 0x1d9   : > { %v1679_v63 = vadd.f32 %v1972_v41, %v2987_v53  ;;  %v1753_v30 = vpop.f32.mrf.mxu1 }
 0x1da   : > { %v1673_v52 = vpop.f32.mrf.mxu0  ;;  %1809 = vst.msk [vmem:[%s2994_s14 + $0xd8] sm:$0xff] %vm1385_vm4, %v1759_v59  ;;  %v1754_v5 = vadd.f32 %v2987_v53, %v1753_v30 }
 0x1db   : > { %1793 = vst.msk [vmem:[%s2994_s14 + $0x58] sm:$0xff] %vm1385_vm4, %v1679_v63  ;;  %v1674_v57 = vadd.f32 %v2987_v53, %v1673_v52 }
 0x1dc   : > { %1808 = vst.msk [vmem:[%s2994_s14 + $0xd0] sm:$0xff] %vm1385_vm4, %v1754_v5 }
 0x1dd   : > { %1792 = vst.msk [vmem:[%s2994_s14 + $0x50] sm:$0xff] %vm1385_vm4, %v1674_v57 }
 0x1ef   : > { %v1999_v27 = vpop.f32.mrf.mxu1 }
 0x1f0   : > { %v1975_v25 = vpop.f32.mrf.mxu0  ;;  %v1769_v26 = vadd.f32 %v1999_v27, %v2987_v53 }
 0x1f1   : > { %v1689_v28 = vadd.f32 %v1975_v25, %v2987_v53  ;;  %v1763_v42 = vpop.f32.mrf.mxu1 }
 0x1f2   : > { %v1683_v43 = vpop.f32.mrf.mxu0  ;;  %1811 = vst.msk [vmem:[%s2994_s14 + $0xe8] sm:$0xff] %vm1385_vm4, %v1769_v26  ;;  %v1764_v39 = vadd.f32 %v2987_v53, %v1763_v42 }
 0x1f3   : > { %1795 = vst.msk [vmem:[%s2994_s14 + $0x68] sm:$0xff] %vm1385_vm4, %v1689_v28  ;;  %v1684_v22 = vadd.f32 %v2987_v53, %v1683_v43 }
 0x1f4   : > { %1810 = vst.msk [vmem:[%s2994_s14 + $0xe0] sm:$0xff] %vm1385_vm4, %v1764_v39 }
 0x1f5   : > { %1794 = vst.msk [vmem:[%s2994_s14 + $0x60] sm:$0xff] %vm1385_vm4, %v1684_v22 }
 0x203   : > { %v1978_v33 = vpop.f32.mrf.mxu0 }
 0x204   : > { %v1699_v62 = vadd.f32 %v1978_v33, %v2987_v53 }
 0x205   : > { %v2002_v14 = vpop.f32.mrf.mxu1  ;;  %v1693_v6 = vpop.f32.mrf.mxu0 }
 0x206   : > { %v1779_v34 = vadd.f32 %v2002_v14, %v2987_v53  ;;  %1797 = vst.msk [vmem:[%s2994_s14 + $0x78] sm:$0xff] %vm1385_vm4, %v1699_v62  ;;  %v1694_v16 = vadd.f32 %v2987_v53, %v1693_v6 }
 0x207   : > { %v1773_v20 = vpop.f32.mrf.mxu1 }
 0x208   : > { %1813 = vst.msk [vmem:[%s2994_s14 + $0xf8] sm:$0xff] %vm1385_vm4, %v1779_v34  ;;  %v1774_v10 = vadd.f32 %v2987_v53, %v1773_v20  ;;  %1796 = vst.msk [vmem:[%s2994_s14 + $0x70] sm:$0xff] %vm1385_vm4, %v1694_v16 }
 0x20a   : > { %1812 = vst.msk [vmem:[%s2994_s14 + $0xf0] sm:$0xff] %vm1385_vm4, %v1774_v10 }
 0x20b PF: > { %s15_s18 = sadd.s32 1, %s2025_s18  }
 0x20c   : > { %p12_p4 = scmp.ge.s32.totalorder %s15_s18, 4  }
 0x20e   :  { %14 = sbr.rel (!%p12_p4) target bundleno = 1 (0x1), region = 70 }

</bundles_post_ra>
